<compile_context>
chip_gen: v7x
topology: tpu7x:2x2x1
jax: 0.10.0
libtpu: 0.0.40
codegen_flags: <defaults>
</compile_context>

<pallas_src>
import functools
import numpy as np
import jax
import jax.numpy as jnp
from jax.experimental import pallas as pl
from jax.experimental.pallas import tpu as pltpu


# ----------------------------------------------------------------------------
# Geometry construction (host-side, deterministic, vectorized numpy glue)
# ----------------------------------------------------------------------------
def build_faces(H, W):
    """Triangulate the H x W grid plus 2 pole vertices (indices H*W, H*W+1)."""
    def vid(y, x):
        return y * W + x

    n_grid = H * W
    pole_n, pole_s = n_grid, n_grid + 1
    faces = []
    for y in range(H - 1):
        for x in range(W - 1):
            faces.append((vid(y, x), vid(y + 1, x), vid(y, x + 1)))
            faces.append((vid(y + 1, x), vid(y + 1, x + 1), vid(y, x + 1)))
    for x in range(W - 1):
        faces.append((pole_n, vid(0, x), vid(0, x + 1)))
        faces.append((pole_s, vid(H - 1, x + 1), vid(H - 1, x)))
    return np.asarray(faces, dtype=np.int32)


def build_laplacian(faces, n_verts):
    """Uniform mesh Laplacian L = I - D^-1 A (dense, unpadded)."""
    adj = np.zeros((n_verts, n_verts), np.float32)
    for a, b in ((0, 1), (1, 2), (2, 0)):
        adj[faces[:, a], faces[:, b]] = 1.0
        adj[faces[:, b], faces[:, a]] = 1.0
    deg = np.maximum(adj.sum(axis=1, keepdims=True), 1.0)
    return np.eye(n_verts, dtype=np.float32) - adj / deg


def build_operators(faces, n_verts, NP, FP, NPL):
    """Dense one-hot selection / incidence / (padded, transposed) Laplacian."""
    F = faces.shape[0]
    fi = np.arange(F)
    s0t = np.zeros((NP, FP), np.float32)
    s1t = np.zeros((NP, FP), np.float32)
    s2t = np.zeros((NP, FP), np.float32)
    s0t[faces[:, 0], fi] = 1.0
    s1t[faces[:, 1], fi] = 1.0
    s2t[faces[:, 2], fi] = 1.0
    f2vt = np.zeros((FP, NP), np.float32)
    np.add.at(f2vt, (fi, faces[:, 0]), 1.0)
    np.add.at(f2vt, (fi, faces[:, 1]), 1.0)
    np.add.at(f2vt, (fi, faces[:, 2]), 1.0)

    lapm_real = build_laplacian(faces, n_verts)           # (N, N)
    lapmT = np.zeros((NP, NPL), np.float32)
    lapmT[:n_verts, :n_verts] = lapm_real.T
    return s0t, s1t, s2t, f2vt, lapmT


# ----------------------------------------------------------------------------
# Pallas kernel
# ----------------------------------------------------------------------------
def _p2p_kernel(v_ref, tv_ref, tn_ref, tl_ref, s_ref, f2v_ref, lap_ref,
                out_ref, vn_acc, lapsq_acc,
                *, B, Bp, N, f_pos, f_nor, f_lap):
    k = pl.program_id(0)
    nk = pl.num_programs(0)
    TF = s_ref.shape[1] // 3            # face-tile width (lanes)

    @pl.when(k == 0)
    def _init():
        vn_acc[...] = jnp.zeros_like(vn_acc)
        lapsq_acc[...] = jnp.zeros_like(lapsq_acc)

    vb = v_ref[...]                                    # (3Bp, NP) f32
    vb16 = vb.astype(jnp.bfloat16)                     # single cast for all MXU dots

    # ---- fused face-corner gather: ONE native bf16 MXU dot per face tile
    pf = jnp.dot(vb16, s_ref[...], preferred_element_type=jnp.float32)  # (3Bp, 3TF)
    p0 = pf[:, 0:TF]
    p1 = pf[:, TF:2 * TF]
    p2 = pf[:, 2 * TF:3 * TF]
    e1 = p1 - p0
    e2 = p2 - p0

    # ---- cross product for all batches; channel slices are sublane-aligned (Bp % 8 == 0)
    e1x, e1y, e1z = e1[0:Bp], e1[Bp:2 * Bp], e1[2 * Bp:3 * Bp]
    e2x, e2y, e2z = e2[0:Bp], e2[Bp:2 * Bp], e2[2 * Bp:3 * Bp]
    fn = jnp.concatenate([e1y * e2z - e1z * e2y,
                          e1z * e2x - e1x * e2z,
                          e1x * e2y - e1y * e2x], axis=0)               # (3Bp, TF)

    # ---- scatter face normals to vertices (accumulate over face tiles)
    vn_acc[...] += jnp.dot(fn.astype(jnp.bfloat16), f2v_ref[...],
                           preferred_element_type=jnp.float32)          # (3Bp, NP)

    # ---- Laplacian column tile (streamed; overlapped with the face loop)
    lap_part = jnp.dot(vb16, lap_ref[...], preferred_element_type=jnp.float32)  # (3Bp, CL)
    dl = lap_part - tl_ref[...]
    lapsq_acc[...] += dl * dl

    # ---- finalize on the last grid step -------------------------------------
    @pl.when(k == nk - 1)
    def _finalize():
        eps = 1e-8
        NPv = vb.shape[1]
        tv = tv_ref[...]
        tn = tn_ref[...]

        # position MSE (padded batch rows / vertex lanes are zero in both operands)
        d = vb - tv
        sum_pos = jnp.sum(d * d)

        # uniform Laplacian MSE (accumulated squared error over column tiles)
        sum_lap = jnp.sum(lapsq_acc[...])

        # cosine-similarity loss: single rsqrt (EUP) instead of 2 sqrt + divide
        vn = vn_acc[...]
        prod = vn * tn
        dotp = prod[0:Bp] + prod[Bp:2 * Bp] + prod[2 * Bp:3 * Bp]       # (Bp, NP)
        nv2 = (vn[0:Bp] * vn[0:Bp] + vn[Bp:2 * Bp] * vn[Bp:2 * Bp]
               + vn[2 * Bp:3 * Bp] * vn[2 * Bp:3 * Bp])
        nt2 = (tn[0:Bp] * tn[0:Bp] + tn[Bp:2 * Bp] * tn[Bp:2 * Bp]
               + tn[2 * Bp:3 * Bp] * tn[2 * Bp:3 * Bp])
        cos = dotp * jax.lax.rsqrt(jnp.maximum(nv2 * nt2, eps * eps))
        bmask = jax.lax.broadcasted_iota(jnp.int32, (Bp, NPv), 0) < B
        vmask = jax.lax.broadcasted_iota(jnp.int32, (Bp, NPv), 1) < N
        sum_cos = jnp.sum(jnp.where(jnp.logical_and(bmask, vmask), 1.0 - cos, 0.0))

        mse_pos = sum_pos / float(B * N * 3)
        cos_loss = sum_cos / float(B * N)
        mse_lap = sum_lap / float(B * N * 3)
        total = f_pos * mse_pos + f_nor * cos_loss + f_lap * mse_lap

        out_ref[0] = mse_pos
        out_ref[1] = cos_loss
        out_ref[2] = mse_lap
        out_ref[3] = total


# ----------------------------------------------------------------------------
# Wrapper (glue: image -> vertices, padding, operator build, pallas_call)
# ----------------------------------------------------------------------------
def p2p_loss(inputs, target, subdivisions, factor_pos, factor_nor, factor_lap):
    B, C, H, W = inputs.shape
    assert C == 3
    base_height = 2 ** subdivisions
    N = H * W + 2
    NP = max(128, -(-N // 128) * 128)
    Bp = max(8, -(-B // 8) * 8)           # sublane-aligned batch stride per channel

    # pole vertices: mean over the 5 panel corners (same indexing as the buffers)
    cy = np.stack([np.arange(5) * base_height,
                   np.arange(1, 6) * base_height - 1]).astype(np.int32)      # (2, 5)
    cx = np.stack([np.array([0]), np.array([W - 1])]).astype(np.int32)       # (2, 1)
    v_tmp = inputs.reshape(B, 3, H * W)
    v_poles = jnp.mean(inputs[:, :, cy, cx], axis=-1)                        # (B, 3, 2)
    v = jnp.concatenate([v_tmp, v_poles], axis=2)                            # (B, 3, N)

    faces = build_faces(H, W)
    F = faces.shape[0]
    FP0 = max(128, -(-F // 128) * 128)

    # ---- generation-aware tiling / VMEM budget ------------------------------
    try:
        vmem_cap = int(pltpu.get_tpu_info().vmem_capacity_bytes)
    except Exception:
        vmem_cap = 64 * 1024 * 1024                    # conservative (v7x-safe) default
    if vmem_cap >= 96 * 1024 * 1024:                   # v5e / v6e: 128 MiB VMEM
        tf_target, stream_bufs = 1024, 3
        vmem_limit = min(100 * 1024 * 1024, (vmem_cap * 3) // 4)
    else:                                              # v7x: 64 MiB VMEM
        tf_target, stream_bufs = 512, 2
        vmem_limit = min(48 * 1024 * 1024, (vmem_cap * 3) // 4)

    TF = min(FP0, tf_target)               # face-tile width (multiple of 128)
    FP = -(-FP0 // TF) * TF                 # pad face count to a multiple of TF
    n_tiles = FP // TF
    if n_tiles < 3:
        stream_bufs = 2                     # deeper buffering pointless for tiny grids

    # Laplacian column-tile width (streamed across the same face-tile grid)
    CL = -(-NP // n_tiles)
    CL = -(-CL // 128) * 128
    NPL = n_tiles * CL

    s0t, s1t, s2t, f2vt, lapmT = build_operators(faces, N, NP, FP, NPL)

    # interleave the three one-hot selectors per face-tile so ONE MXU dot per
    # grid step gathers all three corners
    s_int = np.concatenate(
        [np.concatenate([s0t[:, t:t + TF], s1t[:, t:t + TF], s2t[:, t:t + TF]],
                        axis=1) for t in range(0, FP, TF)], axis=1)          # (NP, 3*FP)

    # channel-major / batch-in-sublane stacking (batch padded to Bp with zeros):
    # rows = [x_0..x_{Bp-1} | y_0.. | z_0..]
    def stack3(a, width):                                                    # (B,3,N)->(3Bp,width)
        a = jnp.pad(a, ((0, Bp - B), (0, 0), (0, width - N)))
        return a.transpose(1, 0, 2).reshape(3 * Bp, width)

    v_stack = stack3(v, NP)
    tv_stack = stack3(target[:, 0:3, :], NP)
    tn_stack = stack3(target[:, 3:6, :], NP)
    tl_stack = stack3(target[:, 6:9, :], NPL)

    # geometry operators stream as bf16 (0/1 exact, -1/deg well within tolerance)
    s_int_b = jnp.asarray(s_int, dtype=jnp.bfloat16)
    f2v_b = jnp.asarray(f2vt, dtype=jnp.bfloat16)
    lap_b = jnp.asarray(lapmT, dtype=jnp.bfloat16)

    kernel = functools.partial(
        _p2p_kernel, B=B, Bp=Bp, N=N,
        f_pos=float(factor_pos), f_nor=float(factor_nor), f_lap=float(factor_lap))

    cost = pl.CostEstimate(
        flops=int(2 * 3 * Bp * NP * 3 * FP            # fused corner gather
                  + 2 * 3 * Bp * FP * NP              # normal scatter
                  + 2 * 3 * Bp * NP * NPL             # laplacian
                  + 30 * 3 * Bp * NP),                # elementwise epilogue
        transcendentals=int(Bp * NP),
        bytes_accessed=int(2 * (s_int_b.size + f2v_b.size + lap_b.size)
                           + 4 * (v_stack.size + tv_stack.size
                                  + tn_stack.size + tl_stack.size) + 16))

    def run(use_buffered):
        def spec(shape, imap, bufs=None):
            # deeper buffering for streamed operands on big-VMEM chips (v5e/v6e)
            if (use_buffered and bufs is not None and bufs != 2
                    and hasattr(pl, "Buffered")):
                try:
                    return pl.BlockSpec(shape, imap, pipeline_mode=pl.Buffered(bufs))
                except TypeError:
                    pass
            return pl.BlockSpec(shape, imap)

        grid_spec = pltpu.PrefetchScalarGridSpec(
            num_scalar_prefetch=0,
            grid=(n_tiles,),
            in_specs=[
                spec((3 * Bp, NP), lambda k: (0, 0)),                     # v (resident, tiny)
                spec((3 * Bp, NP), lambda k: (0, 0)),                     # target positions
                spec((3 * Bp, NP), lambda k: (0, 0)),                     # target normals
                spec((3 * Bp, CL), lambda k: (0, k), bufs=stream_bufs),   # target lap (col tiles)
                spec((NP, 3 * TF), lambda k: (0, k), bufs=stream_bufs),   # fused selectors (tiled)
                spec((TF, NP), lambda k: (k, 0), bufs=stream_bufs),       # face->vertex (tiled)
                spec((NP, CL), lambda k: (0, k), bufs=stream_bufs),       # laplacian (col tiles)
            ],
            out_specs=pl.BlockSpec(memory_space=pltpu.MemorySpace.SMEM),
            scratch_shapes=[pltpu.VMEM((3 * Bp, NP), jnp.float32),        # vertex-normal acc
                            pltpu.VMEM((3 * Bp, CL), jnp.float32)],       # lap sq-error acc
        )
        return pl.pallas_call(
            kernel,
            out_shape=jax.ShapeDtypeStruct((4,), jnp.float32),
            grid_spec=grid_spec,
            compiler_params=pltpu.CompilerParams(
                dimension_semantics=("arbitrary",),          # reduction over face tiles
                vmem_limit_bytes=int(vmem_limit)),
            cost_estimate=cost,
        )(v_stack, tv_stack, tn_stack, tl_stack, s_int_b, f2v_b, lap_b)

    try:
        return run(True)
    except Exception:
        # fallback if pipeline_mode=pl.Buffered is unavailable in this jax build
        return run(False)


# ----------------------------------------------------------------------------
# Pure-JAX reference (gather/scatter formulation) for verification
# ----------------------------------------------------------------------------
def p2p_loss_ref(inputs, target, subdivisions, factor_pos, factor_nor, factor_lap):
    B, C, H, W = inputs.shape
    base_height = 2 ** subdivisions
    N = H * W + 2
    cy = np.stack([np.arange(5) * base_height,
                   np.arange(1, 6) * base_height - 1]).astype(np.int32)
    cx = np.stack([np.array([0]), np.array([W - 1])]).astype(np.int32)
    v_tmp = inputs.reshape(B, 3, H * W)
    v_poles = jnp.mean(inputs[:, :, cy, cx], axis=-1)
    v = jnp.concatenate([v_tmp, v_poles], axis=2).transpose(0, 2, 1)         # (B, N, 3)
    t = target.transpose(0, 2, 1)                                            # (B, N, 9)
    tv, tn, tl = t[..., 0:3], t[..., 3:6], t[..., 6:9]

    faces = build_faces(H, W)
    lapm_real = build_laplacian(faces, N)

    p0, p1, p2 = v[:, faces[:, 0]], v[:, faces[:, 1]], v[:, faces[:, 2]]
    fnorm = jnp.cross(p1 - p0, p2 - p0)
    vn = jnp.zeros_like(v)
    vn = (vn.at[:, faces[:, 0]].add(fnorm)
            .at[:, faces[:, 1]].add(fnorm)
            .at[:, faces[:, 2]].add(fnorm))

    mse_pos = jnp.mean((v - tv) ** 2)
    cos = jnp.sum(vn * tn, -1) / jnp.maximum(
        jnp.linalg.norm(vn, axis=-1) * jnp.linalg.norm(tn, axis=-1), 1e-8)
    cos_loss = jnp.mean(1.0 - cos)
    lap = jnp.einsum('mn,bnc->bmc', jnp.asarray(lapm_real), v)
    mse_lap = jnp.mean((lap - tl) ** 2)
    total = factor_pos * mse_pos + factor_nor * cos_loss + factor_lap * mse_lap
    return jnp.stack([mse_pos, cos_loss, mse_lap, total])


# ----------------------------------------------------------------------------
if __name__ == "__main__":
    subdivisions = 1
    factor_pos, factor_nor, factor_lap = 1.0, 0.1, 0.5

    B = 2
    base_height = 2 ** subdivisions
    H = 5 * base_height          # 10
    W = 2 * base_height          # 4
    N = H * W + 2                # 42 vertices

    key = jax.random.PRNGKey(0)
    k1, k2 = jax.random.split(key)
    inputs = jax.random.normal(k1, (B, 3, H, W), dtype=jnp.float32)   # NCHW
    target = jax.random.normal(k2, (B, 9, N), dtype=jnp.float32)      # (B, 9, Nverts)

    out = p2p_loss(inputs, target, subdivisions, factor_pos, factor_nor, factor_lap)
    out = jax.block_until_ready(out)

    ref = jax.block_until_ready(
        p2p_loss_ref(inputs, target, subdivisions, factor_pos, factor_nor, factor_lap))

    np.testing.assert_allclose(np.asarray(out), np.asarray(ref), rtol=2e-2, atol=2e-2)
    print("KERNEL_OK")
</pallas_src>

<mosaic_0001>
module attributes {stable_mosaic.version = 11 : i64} {
  func.func @_p2p_kernel(%arg0: i32, %arg1: memref<24x128xf32, #tpu.memory_space<vmem>>, %arg2: memref<24x128xf32, #tpu.memory_space<vmem>>, %arg3: memref<24x128xf32, #tpu.memory_space<vmem>>, %arg4: memref<24x128xf32, #tpu.memory_space<vmem>>, %arg5: memref<128x384xbf16, #tpu.memory_space<vmem>>, %arg6: memref<128x128xbf16, #tpu.memory_space<vmem>>, %arg7: memref<128x128xbf16, #tpu.memory_space<vmem>>, %arg8: memref<4xf32, #tpu.memory_space<smem>>, %arg9: memref<24x128xf32, #tpu.memory_space<vmem>>, %arg10: memref<24x128xf32, #tpu.memory_space<vmem>>) attributes {dimension_semantics = [#tpu.dimension_semantics<arbitrary>], iteration_bounds = array<i64: 1>, scalar_prefetch = 0 : i64, scratch_operands = 2 : i64, tpu.core_type = #tpu.core_type<tc>, window_params = [{pipeline_mode = #tpu.pipeline_mode<synchronous>, transform_indices = @transform_0, window_bounds = array<i64: 24, 128>}, {pipeline_mode = #tpu.pipeline_mode<synchronous>, transform_indices = @transform_1, window_bounds = array<i64: 24, 128>}, {pipeline_mode = #tpu.pipeline_mode<synchronous>, transform_indices = @transform_2, window_bounds = array<i64: 24, 128>}, {transform_indices = @transform_3, window_bounds = array<i64: 24, 128>}, {transform_indices = @transform_4, window_bounds = array<i64: 128, 384>}, {transform_indices = @transform_5, window_bounds = array<i64: 128, 128>}, {transform_indices = @transform_6, window_bounds = array<i64: 128, 128>}, {transform_indices = @transform_7, window_bounds = array<i64: 4>}]} {
    %c0_i32 = arith.constant 0 : i32
    %0 = arith.cmpi eq, %arg0, %c0_i32 : i32
    %1 = arith.extui %0 : i1 to i32
    %c0_i32_0 = arith.constant 0 : i32
    %2 = arith.cmpi ne, %1, %c0_i32_0 : i32
    scf.if %2 {
      %cst_22 = arith.constant 0.000000e+00 : f32
      %45 = vector.broadcast %cst_22 : f32 to vector<24x128xf32>
      %c0_23 = arith.constant 0 : index
      %c0_24 = arith.constant 0 : index
      %46 = vector.load %arg9[%c0_23, %c0_24] : memref<24x128xf32, #tpu.memory_space<vmem>>, vector<24x128xf32>
      tpu.vector_store %arg9[%c0_23, %c0_24], %45 {strides = array<i32>} : memref<24x128xf32, #tpu.memory_space<vmem>>, vector<24x128xf32>,
      %cst_25 = arith.constant 0.000000e+00 : f32
      %47 = vector.broadcast %cst_25 : f32 to vector<24x128xf32>
      %c0_26 = arith.constant 0 : index
      %c0_27 = arith.constant 0 : index
      %48 = vector.load %arg10[%c0_26, %c0_27] : memref<24x128xf32, #tpu.memory_space<vmem>>, vector<24x128xf32>
      tpu.vector_store %arg10[%c0_26, %c0_27], %47 {strides = array<i32>} : memref<24x128xf32, #tpu.memory_space<vmem>>, vector<24x128xf32>,
    } else {
    }
    %c0 = arith.constant 0 : index
    %c0_1 = arith.constant 0 : index
    %3 = vector.load %arg1[%c0, %c0_1] : memref<24x128xf32, #tpu.memory_space<vmem>>, vector<24x128xf32>
    %4 = arith.truncf %3 : vector<24x128xf32> to vector<24x128xbf16>
    %c0_2 = arith.constant 0 : index
    %c0_3 = arith.constant 0 : index
    %5 = vector.load %arg5[%c0_2, %c0_3] : memref<128x384xbf16, #tpu.memory_space<vmem>>, vector<128x384xbf16>
    %cst = arith.constant dense<0.000000e+00> : vector<24x384xf32>
    %6 = tpu.matmul %4, %5, %cst {dimension_numbers = #tpu.dot_dimension_numbers<[1], [0], [0], [1], [0, 0, 1, 1], [], []>} : vector<24x128xbf16>, vector<128x384xbf16>, vector<24x384xf32> -> vector<24x384xf32>
    %7 = vector.extract_strided_slice %6 {offsets = [0, 0], sizes = [24, 128], strides = [1, 1]} : vector<24x384xf32> to vector<24x128xf32>
    %8 = vector.extract_strided_slice %6 {offsets = [0, 128], sizes = [24, 128], strides = [1, 1]} : vector<24x384xf32> to vector<24x128xf32>
    %9 = vector.extract_strided_slice %6 {offsets = [0, 256], sizes = [24, 128], strides = [1, 1]} : vector<24x384xf32> to vector<24x128xf32>
    %10 = arith.subf %8, %7 : vector<24x128xf32>
    %11 = arith.subf %9, %7 : vector<24x128xf32>
    %12 = vector.extract_strided_slice %10 {offsets = [0, 0], sizes = [8, 128], strides = [1, 1]} : vector<24x128xf32> to vector<8x128xf32>
    %13 = vector.extract_strided_slice %10 {offsets = [8, 0], sizes = [8, 128], strides = [1, 1]} : vector<24x128xf32> to vector<8x128xf32>
    %14 = vector.extract_strided_slice %10 {offsets = [16, 0], sizes = [8, 128], strides = [1, 1]} : vector<24x128xf32> to vector<8x128xf32>
    %15 = vector.extract_strided_slice %11 {offsets = [0, 0], sizes = [8, 128], strides = [1, 1]} : vector<24x128xf32> to vector<8x128xf32>
    %16 = vector.extract_strided_slice %11 {offsets = [8, 0], sizes = [8, 128], strides = [1, 1]} : vector<24x128xf32> to vector<8x128xf32>
    %17 = vector.extract_strided_slice %11 {offsets = [16, 0], sizes = [8, 128], strides = [1, 1]} : vector<24x128xf32> to vector<8x128xf32>
    %18 = arith.mulf %13, %17 : vector<8x128xf32>
    %19 = arith.mulf %14, %16 : vector<8x128xf32>
    %20 = arith.subf %18, %19 : vector<8x128xf32>
    %21 = arith.mulf %14, %15 : vector<8x128xf32>
    %22 = arith.mulf %12, %17 : vector<8x128xf32>
    %23 = arith.subf %21, %22 : vector<8x128xf32>
    %24 = arith.mulf %12, %16 : vector<8x128xf32>
    %25 = arith.mulf %13, %15 : vector<8x128xf32>
    %26 = arith.subf %24, %25 : vector<8x128xf32>
    %27 = tpu.concatenate %20, %23, %26 in 0 : vector<8x128xf32>, vector<8x128xf32>, vector<8x128xf32> -> vector<24x128xf32>
    %c0_4 = arith.constant 0 : index
    %c0_5 = arith.constant 0 : index
    %28 = vector.load %arg9[%c0_4, %c0_5] : memref<24x128xf32, #tpu.memory_space<vmem>>, vector<24x128xf32>
    %29 = arith.truncf %27 : vector<24x128xf32> to vector<24x128xbf16>
    %c0_6 = arith.constant 0 : index
    %c0_7 = arith.constant 0 : index
    %30 = vector.load %arg6[%c0_6, %c0_7] : memref<128x128xbf16, #tpu.memory_space<vmem>>, vector<128x128xbf16>
    %cst_8 = arith.constant dense<0.000000e+00> : vector<24x128xf32>
    %31 = tpu.matmul %29, %30, %cst_8 {dimension_numbers = #tpu.dot_dimension_numbers<[1], [0], [0], [1], [0, 0, 1, 1], [], []>} : vector<24x128xbf16>, vector<128x128xbf16>, vector<24x128xf32> -> vector<24x128xf32>
    %32 = arith.addf %28, %31 : vector<24x128xf32>
    %c0_9 = arith.constant 0 : index
    %c0_10 = arith.constant 0 : index
    %33 = vector.load %arg9[%c0_9, %c0_10] : memref<24x128xf32, #tpu.memory_space<vmem>>, vector<24x128xf32>
    tpu.vector_store %arg9[%c0_9, %c0_10], %32 {strides = array<i32>} : memref<24x128xf32, #tpu.memory_space<vmem>>, vector<24x128xf32>,
    %c0_11 = arith.constant 0 : index
    %c0_12 = arith.constant 0 : index
    %34 = vector.load %arg7[%c0_11, %c0_12] : memref<128x128xbf16, #tpu.memory_space<vmem>>, vector<128x128xbf16>
    %cst_13 = arith.constant dense<0.000000e+00> : vector<24x128xf32>
    %35 = tpu.matmul %4, %34, %cst_13 {dimension_numbers = #tpu.dot_dimension_numbers<[1], [0], [0], [1], [0, 0, 1, 1], [], []>} : vector<24x128xbf16>, vector<128x128xbf16>, vector<24x128xf32> -> vector<24x128xf32>
    %c0_14 = arith.constant 0 : index
    %c0_15 = arith.constant 0 : index
    %36 = vector.load %arg4[%c0_14, %c0_15] : memref<24x128xf32, #tpu.memory_space<vmem>>, vector<24x128xf32>
    %37 = arith.subf %35, %36 : vector<24x128xf32>
    %c0_16 = arith.constant 0 : index
    %c0_17 = arith.constant 0 : index
    %38 = vector.load %arg10[%c0_16, %c0_17] : memref<24x128xf32, #tpu.memory_space<vmem>>, vector<24x128xf32>
    %39 = arith.mulf %37, %37 : vector<24x128xf32>
    %40 = arith.addf %38, %39 : vector<24x128xf32>
    %c0_18 = arith.constant 0 : index
    %c0_19 = arith.constant 0 : index
    %41 = vector.load %arg10[%c0_18, %c0_19] : memref<24x128xf32, #tpu.memory_space<vmem>>, vector<24x128xf32>
    tpu.vector_store %arg10[%c0_18, %c0_19], %40 {strides = array<i32>} : memref<24x128xf32, #tpu.memory_space<vmem>>, vector<24x128xf32>,
    %c0_i32_20 = arith.constant 0 : i32
    %42 = arith.cmpi eq, %arg0, %c0_i32_20 : i32
    %43 = arith.extui %42 : i1 to i32
    %c0_i32_21 = arith.constant 0 : i32
    %44 = arith.cmpi ne, %43, %c0_i32_21 : i32
    scf.if %44 {
      %c0_22 = arith.constant 0 : index
      %c0_23 = arith.constant 0 : index
      %45 = vector.load %arg2[%c0_22, %c0_23] : memref<24x128xf32, #tpu.memory_space<vmem>>, vector<24x128xf32>
      %c0_24 = arith.constant 0 : index
      %c0_25 = arith.constant 0 : index
      %46 = vector.load %arg3[%c0_24, %c0_25] : memref<24x128xf32, #tpu.memory_space<vmem>>, vector<24x128xf32>
      %47 = arith.subf %3, %45 : vector<24x128xf32>
      %48 = arith.mulf %47, %47 : vector<24x128xf32>
      %49 = vector.shape_cast %48 : vector<24x128xf32> to vector<1x24x128xf32>
      %cst_26 = arith.constant dense<0.000000e+00> : vector<1xf32>
      %50 = vector.multi_reduction <add>, %49, %cst_26 [1, 2] : vector<1x24x128xf32> to vector<1xf32>
      %51 = vector.shape_cast %50 : vector<1xf32> to vector<1x1x1xf32>
      %52 = vector.extract %51[0, 0, 0] : f32 from vector<1x1x1xf32>
      %c0_27 = arith.constant 0 : index
      %c0_28 = arith.constant 0 : index
      %53 = vector.load %arg10[%c0_27, %c0_28] : memref<24x128xf32, #tpu.memory_space<vmem>>, vector<24x128xf32>
      %54 = vector.shape_cast %53 : vector<24x128xf32> to vector<1x24x128xf32>
      %cst_29 = arith.constant dense<0.000000e+00> : vector<1xf32>
      %55 = vector.multi_reduction <add>, %54, %cst_29 [1, 2] : vector<1x24x128xf32> to vector<1xf32>
      %56 = vector.shape_cast %55 : vector<1xf32> to vector<1x1x1xf32>
      %57 = vector.extract %56[0, 0, 0] : f32 from vector<1x1x1xf32>
      %c0_30 = arith.constant 0 : index
      %c0_31 = arith.constant 0 : index
      %58 = vector.load %arg9[%c0_30, %c0_31] : memref<24x128xf32, #tpu.memory_space<vmem>>, vector<24x128xf32>
      %59 = arith.mulf %58, %46 : vector<24x128xf32>
      %60 = vector.extract_strided_slice %59 {offsets = [0, 0], sizes = [8, 128], strides = [1, 1]} : vector<24x128xf32> to vector<8x128xf32>
      %61 = vector.extract_strided_slice %59 {offsets = [8, 0], sizes = [8, 128], strides = [1, 1]} : vector<24x128xf32> to vector<8x128xf32>
      %62 = arith.addf %60, %61 : vector<8x128xf32>
      %63 = vector.extract_strided_slice %59 {offsets = [16, 0], sizes = [8, 128], strides = [1, 1]} : vector<24x128xf32> to vector<8x128xf32>
      %64 = arith.addf %62, %63 : vector<8x128xf32>
      %65 = vector.extract_strided_slice %58 {offsets = [0, 0], sizes = [8, 128], strides = [1, 1]} : vector<24x128xf32> to vector<8x128xf32>
      %66 = vector.extract_strided_slice %58 {offsets = [0, 0], sizes = [8, 128], strides = [1, 1]} : vector<24x128xf32> to vector<8x128xf32>
      %67 = arith.mulf %65, %66 : vector<8x128xf32>
      %68 = vector.extract_strided_slice %58 {offsets = [8, 0], sizes = [8, 128], strides = [1, 1]} : vector<24x128xf32> to vector<8x128xf32>
      %69 = vector.extract_strided_slice %58 {offsets = [8, 0], sizes = [8, 128], strides = [1, 1]} : vector<24x128xf32> to vector<8x128xf32>
      %70 = arith.mulf %68, %69 : vector<8x128xf32>
      %71 = arith.addf %67, %70 : vector<8x128xf32>
      %72 = vector.extract_strided_slice %58 {offsets = [16, 0], sizes = [8, 128], strides = [1, 1]} : vector<24x128xf32> to vector<8x128xf32>
      %73 = vector.extract_strided_slice %58 {offsets = [16, 0], sizes = [8, 128], strides = [1, 1]} : vector<24x128xf32> to vector<8x128xf32>
      %74 = arith.mulf %72, %73 : vector<8x128xf32>
      %75 = arith.addf %71, %74 : vector<8x128xf32>
      %76 = vector.extract_strided_slice %46 {offsets = [0, 0], sizes = [8, 128], strides = [1, 1]} : vector<24x128xf32> to vector<8x128xf32>
      %77 = vector.extract_strided_slice %46 {offsets = [0, 0], sizes = [8, 128], strides = [1, 1]} : vector<24x128xf32> to vector<8x128xf32>
      %78 = arith.mulf %76, %77 : vector<8x128xf32>
      %79 = vector.extract_strided_slice %46 {offsets = [8, 0], sizes = [8, 128], strides = [1, 1]} : vector<24x128xf32> to vector<8x128xf32>
      %80 = vector.extract_strided_slice %46 {offsets = [8, 0], sizes = [8, 128], strides = [1, 1]} : vector<24x128xf32> to vector<8x128xf32>
      %81 = arith.mulf %79, %80 : vector<8x128xf32>
      %82 = arith.addf %78, %81 : vector<8x128xf32>
      %83 = vector.extract_strided_slice %46 {offsets = [16, 0], sizes = [8, 128], strides = [1, 1]} : vector<24x128xf32> to vector<8x128xf32>
      %84 = vector.extract_strided_slice %46 {offsets = [16, 0], sizes = [8, 128], strides = [1, 1]} : vector<24x128xf32> to vector<8x128xf32>
      %85 = arith.mulf %83, %84 : vector<8x128xf32>
      %86 = arith.addf %82, %85 : vector<8x128xf32>
      %87 = arith.mulf %75, %86 : vector<8x128xf32>
      %cst_32 = arith.constant 1.000000e-16 : f32
      %88 = vector.broadcast %cst_32 : f32 to vector<8x128xf32>
      %89 = arith.maximumf %87, %88 : vector<8x128xf32>
      %90 = math.rsqrt %89 : vector<8x128xf32>
      %91 = arith.mulf %64, %90 : vector<8x128xf32>
      %92 = tpu.iota {dimensions = array<i32: 0>} : vector<8x128xi32>
      %c2_i32 = arith.constant 2 : i32
      %93 = vector.broadcast %c2_i32 : i32 to vector<8x128xi32>
      %94 = arith.cmpi slt, %92, %93 : vector<8x128xi32>
      %95 = tpu.iota {dimensions = array<i32: 1>} : vector<8x128xi32>
      %c42_i32 = arith.constant 42 : i32
      %96 = vector.broadcast %c42_i32 : i32 to vector<8x128xi32>
      %97 = arith.cmpi slt, %95, %96 : vector<8x128xi32>
      %98 = arith.andi %94, %97 : vector<8x128xi1>
      %cst_33 = arith.constant 1.000000e+00 : f32
      %99 = vector.broadcast %cst_33 : f32 to vector<8x128xf32>
      %100 = arith.subf %99, %91 : vector<8x128xf32>
      %cst_34 = arith.constant 0.000000e+00 : f32
      %101 = vector.broadcast %cst_34 : f32 to vector<8x128xf32>
      %102 = arith.select %98, %100, %101 : vector<8x128xi1>, vector<8x128xf32>
      %103 = vector.shape_cast %102 : vector<8x128xf32> to vector<1x8x128xf32>
      %cst_35 = arith.constant dense<0.000000e+00> : vector<1xf32>
      %104 = vector.multi_reduction <add>, %103, %cst_35 [1, 2] : vector<1x8x128xf32> to vector<1xf32>
      %105 = vector.shape_cast %104 : vector<1xf32> to vector<1x1x1xf32>
      %106 = vector.extract %105[0, 0, 0] : f32 from vector<1x1x1xf32>
      %cst_36 = arith.constant 2.520000e+02 : f32
      %107 = arith.divf %52, %cst_36 : f32
      %cst_37 = arith.constant 8.400000e+01 : f32
      %108 = arith.divf %106, %cst_37 : f32
      %cst_38 = arith.constant 2.520000e+02 : f32
      %109 = arith.divf %57, %cst_38 : f32
      %cst_39 = arith.constant 1.000000e+00 : f32
      %110 = arith.mulf %cst_39, %107 : f32
      %cst_40 = arith.constant 1.000000e-01 : f32
      %111 = arith.mulf %cst_40, %108 : f32
      %112 = arith.addf %110, %111 : f32
      %cst_41 = arith.constant 5.000000e-01 : f32
      %113 = arith.mulf %cst_41, %109 : f32
      %114 = arith.addf %112, %113 : f32
      %c0_42 = arith.constant 0 : index
      %115 = memref.load %arg8[%c0_42] : memref<4xf32, #tpu.memory_space<smem>>
      memref.store %107, %arg8[%c0_42] : memref<4xf32, #tpu.memory_space<smem>>
      %c1 = arith.constant 1 : index
      %116 = memref.load %arg8[%c1] : memref<4xf32, #tpu.memory_space<smem>>
      memref.store %108, %arg8[%c1] : memref<4xf32, #tpu.memory_space<smem>>
      %c2 = arith.constant 2 : index
      %117 = memref.load %arg8[%c2] : memref<4xf32, #tpu.memory_space<smem>>
      memref.store %109, %arg8[%c2] : memref<4xf32, #tpu.memory_space<smem>>
      %c3 = arith.constant 3 : index
      %118 = memref.load %arg8[%c3] : memref<4xf32, #tpu.memory_space<smem>>
      memref.store %114, %arg8[%c3] : memref<4xf32, #tpu.memory_space<smem>>
    } else {
    }
    return
  }
  func.func @transform_0(%arg0: i32) -> (i32, i32) {
    %c0_i32 = arith.constant 0 : i32
    %c0_i32_0 = arith.constant 0 : i32
    %c0_i32_1 = arith.constant 0 : i32
    return %c0_i32, %c0_i32_0 : i32, i32
  }
  func.func @transform_1(%arg0: i32) -> (i32, i32) {
    %c0_i32 = arith.constant 0 : i32
    %c0_i32_0 = arith.constant 0 : i32
    %c0_i32_1 = arith.constant 0 : i32
    return %c0_i32, %c0_i32_0 : i32, i32
  }
  func.func @transform_2(%arg0: i32) -> (i32, i32) {
    %c0_i32 = arith.constant 0 : i32
    %c0_i32_0 = arith.constant 0 : i32
    %c0_i32_1 = arith.constant 0 : i32
    return %c0_i32, %c0_i32_0 : i32, i32
  }
  func.func @transform_3(%arg0: i32) -> (i32, i32) {
    %c0_i32 = arith.constant 0 : i32
    %c0_i32_0 = arith.constant 0 : i32
    return %c0_i32, %arg0 : i32, i32
  }
  func.func @transform_4(%arg0: i32) -> (i32, i32) {
    %c0_i32 = arith.constant 0 : i32
    %c0_i32_0 = arith.constant 0 : i32
    return %c0_i32, %arg0 : i32, i32
  }
  func.func @transform_5(%arg0: i32) -> (i32, i32) {
    %c0_i32 = arith.constant 0 : i32
    %c0_i32_0 = arith.constant 0 : i32
    return %arg0, %c0_i32 : i32, i32
  }
  func.func @transform_6(%arg0: i32) -> (i32, i32) {
    %c0_i32 = arith.constant 0 : i32
    %c0_i32_0 = arith.constant 0 : i32
    return %c0_i32, %arg0 : i32, i32
  }
  func.func @transform_7(%arg0: i32) -> i32 {
    %c0_i32 = arith.constant 0 : i32
    %c0_i32_0 = arith.constant 0 : i32
    return %c0_i32 : i32
  }
}

module attributes {stable_mosaic.version = 11 : i64} {
  func.func @_p2p_kernel(%arg0: i32, %arg1: memref<24x128xf32, #tpu.memory_space<vmem>>, %arg2: memref<24x128xf32, #tpu.memory_space<vmem>>, %arg3: memref<24x128xf32, #tpu.memory_space<vmem>>, %arg4: memref<24x128xf32, #tpu.memory_space<vmem>>, %arg5: memref<128x384xbf16, #tpu.memory_space<vmem>>, %arg6: memref<128x128xbf16, #tpu.memory_space<vmem>>, %arg7: memref<128x128xbf16, #tpu.memory_space<vmem>>, %arg8: memref<4xf32, #tpu.memory_space<smem>>, %arg9: memref<24x128xf32, #tpu.memory_space<vmem>>, %arg10: memref<24x128xf32, #tpu.memory_space<vmem>>) attributes {dimension_semantics = [#tpu.dimension_semantics<arbitrary>], iteration_bounds = array<i64: 1>, scalar_prefetch = 0 : i64, scratch_operands = 2 : i64, tpu.core_type = #tpu.core_type<tc>, window_params = [{pipeline_mode = #tpu.pipeline_mode<synchronous>, transform_indices = @transform_0, window_bounds = array<i64: 24, 128>}, {pipeline_mode = #tpu.pipeline_mode<synchronous>, transform_indices = @transform_1, window_bounds = array<i64: 24, 128>}, {pipeline_mode = #tpu.pipeline_mode<synchronous>, transform_indices = @transform_2, window_bounds = array<i64: 24, 128>}, {transform_indices = @transform_3, window_bounds = array<i64: 24, 128>}, {transform_indices = @transform_4, window_bounds = array<i64: 128, 384>}, {transform_indices = @transform_5, window_bounds = array<i64: 128, 128>}, {transform_indices = @transform_6, window_bounds = array<i64: 128, 128>}, {transform_indices = @transform_7, window_bounds = array<i64: 4>}]} {
    %c0_i32 = arith.constant 0 : i32
    %0 = arith.cmpi eq, %arg0, %c0_i32 : i32
    %1 = arith.extui %0 : i1 to i32
    %c0_i32_0 = arith.constant 0 : i32
    %2 = arith.cmpi ne, %1, %c0_i32_0 : i32
    scf.if %2 {
      %cst_22 = arith.constant 0.000000e+00 : f32
      %45 = vector.broadcast %cst_22 : f32 to vector<24x128xf32>
      %c0_23 = arith.constant 0 : index
      %c0_24 = arith.constant 0 : index
      %46 = vector.load %arg9[%c0_23, %c0_24] : memref<24x128xf32, #tpu.memory_space<vmem>>, vector<24x128xf32>
      tpu.vector_store %arg9[%c0_23, %c0_24], %45 {strides = array<i32>} : memref<24x128xf32, #tpu.memory_space<vmem>>, vector<24x128xf32>,
      %cst_25 = arith.constant 0.000000e+00 : f32
      %47 = vector.broadcast %cst_25 : f32 to vector<24x128xf32>
      %c0_26 = arith.constant 0 : index
      %c0_27 = arith.constant 0 : index
      %48 = vector.load %arg10[%c0_26, %c0_27] : memref<24x128xf32, #tpu.memory_space<vmem>>, vector<24x128xf32>
      tpu.vector_store %arg10[%c0_26, %c0_27], %47 {strides = array<i32>} : memref<24x128xf32, #tpu.memory_space<vmem>>, vector<24x128xf32>,
    } else {
    }
    %c0 = arith.constant 0 : index
    %c0_1 = arith.constant 0 : index
    %3 = vector.load %arg1[%c0, %c0_1] : memref<24x128xf32, #tpu.memory_space<vmem>>, vector<24x128xf32>
    %4 = arith.truncf %3 : vector<24x128xf32> to vector<24x128xbf16>
    %c0_2 = arith.constant 0 : index
    %c0_3 = arith.constant 0 : index
    %5 = vector.load %arg5[%c0_2, %c0_3] : memref<128x384xbf16, #tpu.memory_space<vmem>>, vector<128x384xbf16>
    %cst = arith.constant dense<0.000000e+00> : vector<24x384xf32>
    %6 = tpu.matmul %4, %5, %cst {dimension_numbers = #tpu.dot_dimension_numbers<[1], [0], [0], [1], [0, 0, 1, 1], [], []>} : vector<24x128xbf16>, vector<128x384xbf16>, vector<24x384xf32> -> vector<24x384xf32>
    %7 = vector.extract_strided_slice %6 {offsets = [0, 0], sizes = [24, 128], strides = [1, 1]} : vector<24x384xf32> to vector<24x128xf32>
    %8 = vector.extract_strided_slice %6 {offsets = [0, 128], sizes = [24, 128], strides = [1, 1]} : vector<24x384xf32> to vector<24x128xf32>
    %9 = vector.extract_strided_slice %6 {offsets = [0, 256], sizes = [24, 128], strides = [1, 1]} : vector<24x384xf32> to vector<24x128xf32>
    %10 = arith.subf %8, %7 : vector<24x128xf32>
    %11 = arith.subf %9, %7 : vector<24x128xf32>
    %12 = vector.extract_strided_slice %10 {offsets = [0, 0], sizes = [8, 128], strides = [1, 1]} : vector<24x128xf32> to vector<8x128xf32>
    %13 = vector.extract_strided_slice %10 {offsets = [8, 0], sizes = [8, 128], strides = [1, 1]} : vector<24x128xf32> to vector<8x128xf32>
    %14 = vector.extract_strided_slice %10 {offsets = [16, 0], sizes = [8, 128], strides = [1, 1]} : vector<24x128xf32> to vector<8x128xf32>
    %15 = vector.extract_strided_slice %11 {offsets = [0, 0], sizes = [8, 128], strides = [1, 1]} : vector<24x128xf32> to vector<8x128xf32>
    %16 = vector.extract_strided_slice %11 {offsets = [8, 0], sizes = [8, 128], strides = [1, 1]} : vector<24x128xf32> to vector<8x128xf32>
    %17 = vector.extract_strided_slice %11 {offsets = [16, 0], sizes = [8, 128], strides = [1, 1]} : vector<24x128xf32> to vector<8x128xf32>
    %18 = arith.mulf %13, %17 : vector<8x128xf32>
    %19 = arith.mulf %14, %16 : vector<8x128xf32>
    %20 = arith.subf %18, %19 : vector<8x128xf32>
    %21 = arith.mulf %14, %15 : vector<8x128xf32>
    %22 = arith.mulf %12, %17 : vector<8x128xf32>
    %23 = arith.subf %21, %22 : vector<8x128xf32>
    %24 = arith.mulf %12, %16 : vector<8x128xf32>
    %25 = arith.mulf %13, %15 : vector<8x128xf32>
    %26 = arith.subf %24, %25 : vector<8x128xf32>
    %27 = tpu.concatenate %20, %23, %26 in 0 : vector<8x128xf32>, vector<8x128xf32>, vector<8x128xf32> -> vector<24x128xf32>
    %c0_4 = arith.constant 0 : index
    %c0_5 = arith.constant 0 : index
    %28 = vector.load %arg9[%c0_4, %c0_5] : memref<24x128xf32, #tpu.memory_space<vmem>>, vector<24x128xf32>
    %29 = arith.truncf %27 : vector<24x128xf32> to vector<24x128xbf16>
    %c0_6 = arith.constant 0 : index
    %c0_7 = arith.constant 0 : index
    %30 = vector.load %arg6[%c0_6, %c0_7] : memref<128x128xbf16, #tpu.memory_space<vmem>>, vector<128x128xbf16>
    %cst_8 = arith.constant dense<0.000000e+00> : vector<24x128xf32>
    %31 = tpu.matmul %29, %30, %cst_8 {dimension_numbers = #tpu.dot_dimension_numbers<[1], [0], [0], [1], [0, 0, 1, 1], [], []>} : vector<24x128xbf16>, vector<128x128xbf16>, vector<24x128xf32> -> vector<24x128xf32>
    %32 = arith.addf %28, %31 : vector<24x128xf32>
    %c0_9 = arith.constant 0 : index
    %c0_10 = arith.constant 0 : index
    %33 = vector.load %arg9[%c0_9, %c0_10] : memref<24x128xf32, #tpu.memory_space<vmem>>, vector<24x128xf32>
    tpu.vector_store %arg9[%c0_9, %c0_10], %32 {strides = array<i32>} : memref<24x128xf32, #tpu.memory_space<vmem>>, vector<24x128xf32>,
    %c0_11 = arith.constant 0 : index
    %c0_12 = arith.constant 0 : index
    %34 = vector.load %arg7[%c0_11, %c0_12] : memref<128x128xbf16, #tpu.memory_space<vmem>>, vector<128x128xbf16>
    %cst_13 = arith.constant dense<0.000000e+00> : vector<24x128xf32>
    %35 = tpu.matmul %4, %34, %cst_13 {dimension_numbers = #tpu.dot_dimension_numbers<[1], [0], [0], [1], [0, 0, 1, 1], [], []>} : vector<24x128xbf16>, vector<128x128xbf16>, vector<24x128xf32> -> vector<24x128xf32>
    %c0_14 = arith.constant 0 : index
    %c0_15 = arith.constant 0 : index
    %36 = vector.load %arg4[%c0_14, %c0_15] : memref<24x128xf32, #tpu.memory_space<vmem>>, vector<24x128xf32>
    %37 = arith.subf %35, %36 : vector<24x128xf32>
    %c0_16 = arith.constant 0 : index
    %c0_17 = arith.constant 0 : index
    %38 = vector.load %arg10[%c0_16, %c0_17] : memref<24x128xf32, #tpu.memory_space<vmem>>, vector<24x128xf32>
    %39 = arith.mulf %37, %37 : vector<24x128xf32>
    %40 = arith.addf %38, %39 : vector<24x128xf32>
    %c0_18 = arith.constant 0 : index
    %c0_19 = arith.constant 0 : index
    %41 = vector.load %arg10[%c0_18, %c0_19] : memref<24x128xf32, #tpu.memory_space<vmem>>, vector<24x128xf32>
    tpu.vector_store %arg10[%c0_18, %c0_19], %40 {strides = array<i32>} : memref<24x128xf32, #tpu.memory_space<vmem>>, vector<24x128xf32>,
    %c0_i32_20 = arith.constant 0 : i32
    %42 = arith.cmpi eq, %arg0, %c0_i32_20 : i32
    %43 = arith.extui %42 : i1 to i32
    %c0_i32_21 = arith.constant 0 : i32
    %44 = arith.cmpi ne, %43, %c0_i32_21 : i32
    scf.if %44 {
      %c0_22 = arith.constant 0 : index
      %c0_23 = arith.constant 0 : index
      %45 = vector.load %arg2[%c0_22, %c0_23] : memref<24x128xf32, #tpu.memory_space<vmem>>, vector<24x128xf32>
      %c0_24 = arith.constant 0 : index
      %c0_25 = arith.constant 0 : index
      %46 = vector.load %arg3[%c0_24, %c0_25] : memref<24x128xf32, #tpu.memory_space<vmem>>, vector<24x128xf32>
      %47 = arith.subf %3, %45 : vector<24x128xf32>
      %48 = arith.mulf %47, %47 : vector<24x128xf32>
      %49 = vector.shape_cast %48 : vector<24x128xf32> to vector<1x24x128xf32>
      %cst_26 = arith.constant dense<0.000000e+00> : vector<1xf32>
      %50 = vector.multi_reduction <add>, %49, %cst_26 [1, 2] : vector<1x24x128xf32> to vector<1xf32>
      %51 = vector.shape_cast %50 : vector<1xf32> to vector<1x1x1xf32>
      %52 = vector.extract %51[0, 0, 0] : f32 from vector<1x1x1xf32>
      %c0_27 = arith.constant 0 : index
      %c0_28 = arith.constant 0 : index
      %53 = vector.load %arg10[%c0_27, %c0_28] : memref<24x128xf32, #tpu.memory_space<vmem>>, vector<24x128xf32>
      %54 = vector.shape_cast %53 : vector<24x128xf32> to vector<1x24x128xf32>
      %cst_29 = arith.constant dense<0.000000e+00> : vector<1xf32>
      %55 = vector.multi_reduction <add>, %54, %cst_29 [1, 2] : vector<1x24x128xf32> to vector<1xf32>
      %56 = vector.shape_cast %55 : vector<1xf32> to vector<1x1x1xf32>
      %57 = vector.extract %56[0, 0, 0] : f32 from vector<1x1x1xf32>
      %c0_30 = arith.constant 0 : index
      %c0_31 = arith.constant 0 : index
      %58 = vector.load %arg9[%c0_30, %c0_31] : memref<24x128xf32, #tpu.memory_space<vmem>>, vector<24x128xf32>
      %59 = arith.mulf %58, %46 : vector<24x128xf32>
      %60 = vector.extract_strided_slice %59 {offsets = [0, 0], sizes = [8, 128], strides = [1, 1]} : vector<24x128xf32> to vector<8x128xf32>
      %61 = vector.extract_strided_slice %59 {offsets = [8, 0], sizes = [8, 128], strides = [1, 1]} : vector<24x128xf32> to vector<8x128xf32>
      %62 = arith.addf %60, %61 : vector<8x128xf32>
      %63 = vector.extract_strided_slice %59 {offsets = [16, 0], sizes = [8, 128], strides = [1, 1]} : vector<24x128xf32> to vector<8x128xf32>
      %64 = arith.addf %62, %63 : vector<8x128xf32>
      %65 = vector.extract_strided_slice %58 {offsets = [0, 0], sizes = [8, 128], strides = [1, 1]} : vector<24x128xf32> to vector<8x128xf32>
      %66 = vector.extract_strided_slice %58 {offsets = [0, 0], sizes = [8, 128], strides = [1, 1]} : vector<24x128xf32> to vector<8x128xf32>
      %67 = arith.mulf %65, %66 : vector<8x128xf32>
      %68 = vector.extract_strided_slice %58 {offsets = [8, 0], sizes = [8, 128], strides = [1, 1]} : vector<24x128xf32> to vector<8x128xf32>
      %69 = vector.extract_strided_slice %58 {offsets = [8, 0], sizes = [8, 128], strides = [1, 1]} : vector<24x128xf32> to vector<8x128xf32>
      %70 = arith.mulf %68, %69 : vector<8x128xf32>
      %71 = arith.addf %67, %70 : vector<8x128xf32>
      %72 = vector.extract_strided_slice %58 {offsets = [16, 0], sizes = [8, 128], strides = [1, 1]} : vector<24x128xf32> to vector<8x128xf32>
      %73 = vector.extract_strided_slice %58 {offsets = [16, 0], sizes = [8, 128], strides = [1, 1]} : vector<24x128xf32> to vector<8x128xf32>
      %74 = arith.mulf %72, %73 : vector<8x128xf32>
      %75 = arith.addf %71, %74 : vector<8x128xf32>
      %76 = vector.extract_strided_slice %46 {offsets = [0, 0], sizes = [8, 128], strides = [1, 1]} : vector<24x128xf32> to vector<8x128xf32>
      %77 = vector.extract_strided_slice %46 {offsets = [0, 0], sizes = [8, 128], strides = [1, 1]} : vector<24x128xf32> to vector<8x128xf32>
      %78 = arith.mulf %76, %77 : vector<8x128xf32>
      %79 = vector.extract_strided_slice %46 {offsets = [8, 0], sizes = [8, 128], strides = [1, 1]} : vector<24x128xf32> to vector<8x128xf32>
      %80 = vector.extract_strided_slice %46 {offsets = [8, 0], sizes = [8, 128], strides = [1, 1]} : vector<24x128xf32> to vector<8x128xf32>
      %81 = arith.mulf %79, %80 : vector<8x128xf32>
      %82 = arith.addf %78, %81 : vector<8x128xf32>
      %83 = vector.extract_strided_slice %46 {offsets = [16, 0], sizes = [8, 128], strides = [1, 1]} : vector<24x128xf32> to vector<8x128xf32>
      %84 = vector.extract_strided_slice %46 {offsets = [16, 0], sizes = [8, 128], strides = [1, 1]} : vector<24x128xf32> to vector<8x128xf32>
      %85 = arith.mulf %83, %84 : vector<8x128xf32>
      %86 = arith.addf %82, %85 : vector<8x128xf32>
      %87 = arith.mulf %75, %86 : vector<8x128xf32>
      %cst_32 = arith.constant 1.000000e-16 : f32
      %88 = vector.broadcast %cst_32 : f32 to vector<8x128xf32>
      %89 = arith.maximumf %87, %88 : vector<8x128xf32>
      %90 = math.rsqrt %89 : vector<8x128xf32>
      %91 = arith.mulf %64, %90 : vector<8x128xf32>
      %92 = tpu.iota {dimensions = array<i32: 0>} : vector<8x128xi32>
      %c2_i32 = arith.constant 2 : i32
      %93 = vector.broadcast %c2_i32 : i32 to vector<8x128xi32>
      %94 = arith.cmpi slt, %92, %93 : vector<8x128xi32>
      %95 = tpu.iota {dimensions = array<i32: 1>} : vector<8x128xi32>
      %c42_i32 = arith.constant 42 : i32
      %96 = vector.broadcast %c42_i32 : i32 to vector<8x128xi32>
      %97 = arith.cmpi slt, %95, %96 : vector<8x128xi32>
      %98 = arith.andi %94, %97 : vector<8x128xi1>
      %cst_33 = arith.constant 1.000000e+00 : f32
      %99 = vector.broadcast %cst_33 : f32 to vector<8x128xf32>
      %100 = arith.subf %99, %91 : vector<8x128xf32>
      %cst_34 = arith.constant 0.000000e+00 : f32
      %101 = vector.broadcast %cst_34 : f32 to vector<8x128xf32>
      %102 = arith.select %98, %100, %101 : vector<8x128xi1>, vector<8x128xf32>
      %103 = vector.shape_cast %102 : vector<8x128xf32> to vector<1x8x128xf32>
      %cst_35 = arith.constant dense<0.000000e+00> : vector<1xf32>
      %104 = vector.multi_reduction <add>, %103, %cst_35 [1, 2] : vector<1x8x128xf32> to vector<1xf32>
      %105 = vector.shape_cast %104 : vector<1xf32> to vector<1x1x1xf32>
      %106 = vector.extract %105[0, 0, 0] : f32 from vector<1x1x1xf32>
      %cst_36 = arith.constant 2.520000e+02 : f32
      %107 = arith.divf %52, %cst_36 : f32
      %cst_37 = arith.constant 8.400000e+01 : f32
      %108 = arith.divf %106, %cst_37 : f32
      %cst_38 = arith.constant 2.520000e+02 : f32
      %109 = arith.divf %57, %cst_38 : f32
      %cst_39 = arith.constant 1.000000e+00 : f32
      %110 = arith.mulf %cst_39, %107 : f32
      %cst_40 = arith.constant 1.000000e-01 : f32
      %111 = arith.mulf %cst_40, %108 : f32
      %112 = arith.addf %110, %111 : f32
      %cst_41 = arith.constant 5.000000e-01 : f32
      %113 = arith.mulf %cst_41, %109 : f32
      %114 = arith.addf %112, %113 : f32
      %c0_42 = arith.constant 0 : index
      %115 = memref.load %arg8[%c0_42] : memref<4xf32, #tpu.memory_space<smem>>
      memref.store %107, %arg8[%c0_42] : memref<4xf32, #tpu.memory_space<smem>>
      %c1 = arith.constant 1 : index
      %116 = memref.load %arg8[%c1] : memref<4xf32, #tpu.memory_space<smem>>
      memref.store %108, %arg8[%c1] : memref<4xf32, #tpu.memory_space<smem>>
      %c2 = arith.constant 2 : index
      %117 = memref.load %arg8[%c2] : memref<4xf32, #tpu.memory_space<smem>>
      memref.store %109, %arg8[%c2] : memref<4xf32, #tpu.memory_space<smem>>
      %c3 = arith.constant 3 : index
      %118 = memref.load %arg8[%c3] : memref<4xf32, #tpu.memory_space<smem>>
      memref.store %114, %arg8[%c3] : memref<4xf32, #tpu.memory_space<smem>>
    } else {
    }
    return
  }
  func.func @transform_0(%arg0: i32) -> (i32, i32) {
    %c0_i32 = arith.constant 0 : i32
    %c0_i32_0 = arith.constant 0 : i32
    %c0_i32_1 = arith.constant 0 : i32
    return %c0_i32, %c0_i32_0 : i32, i32
  }
  func.func @transform_1(%arg0: i32) -> (i32, i32) {
    %c0_i32 = arith.constant 0 : i32
    %c0_i32_0 = arith.constant 0 : i32
    %c0_i32_1 = arith.constant 0 : i32
    return %c0_i32, %c0_i32_0 : i32, i32
  }
  func.func @transform_2(%arg0: i32) -> (i32, i32) {
    %c0_i32 = arith.constant 0 : i32
    %c0_i32_0 = arith.constant 0 : i32
    %c0_i32_1 = arith.constant 0 : i32
    return %c0_i32, %c0_i32_0 : i32, i32
  }
  func.func @transform_3(%arg0: i32) -> (i32, i32) {
    %c0_i32 = arith.constant 0 : i32
    %c0_i32_0 = arith.constant 0 : i32
    return %c0_i32, %arg0 : i32, i32
  }
  func.func @transform_4(%arg0: i32) -> (i32, i32) {
    %c0_i32 = arith.constant 0 : i32
    %c0_i32_0 = arith.constant 0 : i32
    return %c0_i32, %arg0 : i32, i32
  }
  func.func @transform_5(%arg0: i32) -> (i32, i32) {
    %c0_i32 = arith.constant 0 : i32
    %c0_i32_0 = arith.constant 0 : i32
    return %arg0, %c0_i32 : i32, i32
  }
  func.func @transform_6(%arg0: i32) -> (i32, i32) {
    %c0_i32 = arith.constant 0 : i32
    %c0_i32_0 = arith.constant 0 : i32
    return %c0_i32, %arg0 : i32, i32
  }
  func.func @transform_7(%arg0: i32) -> i32 {
    %c0_i32 = arith.constant 0 : i32
    %c0_i32_0 = arith.constant 0 : i32
    return %c0_i32 : i32
  }
}

</mosaic_0001>

<bundles_post_ra>
// kernel: tpu_custom_call.1
= control target key start
LH: loop header
LB: loop body
LE: loop exit
PB: predicated region body
PF: predicated region fallthrough
CT: control target
= control target key end

     0   :  { %12 = vsyncpa [#allocation5], 0  ;;  %s1349_s0 = inlined_call_operand.hbm [shape: f32[24,128], index: 0, kind: input, shape index: {}]   ;;  %s1350_s1 = inlined_call_operand.hbm [shape: f32[24,128], index: 1, kind: input, shape index: {}]   ;;  %s1351_s2 = inlined_call_operand.hbm [shape: f32[24,128], index: 2, kind: input, shape index: {}]   ;;  %s1352_s3 = inlined_call_operand.hbm [shape: f32[24,128], index: 3, kind: input, shape index: {}]   ;;  %s1353_s4 = inlined_call_operand.hbm [shape: bf16[128,384], index: 4, kind: input, shape index: {}]   ;;  %s1354_s5 = inlined_call_operand.hbm [shape: bf16[128,128], index: 5, kind: input, shape index: {}]   ;;  %s1355_s6 = inlined_call_operand.hbm [shape: bf16[128,128], index: 6, kind: input, shape index: {}]   ;;  %s1356_s7 = inlined_call_operand.hbm [shape: f32[4], index: 7, kind: output, shape index: {}]  }
   0x1   :  { %13 = vsyncpa [#allocation8], 0 }
   0x2   :  { %14 = vsyncpa [#allocation11], 0 }
   0x3   :  { %15 = vsyncpa [#allocation14], 0 }
   0x4   :  { %16 = vsyncpa [#allocation6], 0  ;;  %s1158_s24 = smov [#allocation7]   ;;  %s1159_s26 = smov [#allocation10]  }
   0x5   :  { %s34_s25 = sshll.u32 %s1158_s24, 4  ;;  %s58_s27 = sshll.u32 %s1159_s26, 4  ;;  %s35_s25 = int_to_ptr.vmem [resolvable:$true] %s34_s25  ;;  %s1213_s27 = int_to_ptr.vmem [resolvable:$true] %s58_s27 }
   0x6   :  { %s984_s30 = scalar_lea.hbm %s1350_s1, 384 }
   0x7   :  { %p985_p0 = scmp.ne.s32.totalorder %s1350_s1, %s984_s30  ;;  %p988_p1 = scmp.lt.u32.totalorder %s984_s30, %s1350_s1 }
   0x9   :  { %p990_p2 = pnand %p988_p1, %p985_p0 }
   0xb   :  { %993 = shalt.err (!%p990_p2)
}
   0xc   :  { %s994_s12 = scalar_lea.vmem %s35_s25, 384  ;;  %p999_p4 = scmp.lt.s32.totalorder %s35_s25, %s35_s25 }
   0xd   :  { %p995_p3 = scmp.ne.s32.totalorder %s35_s25, %s994_s12  ;;  %p1000_p5 = scmp.lt.s32.totalorder %s994_s12, %s994_s12 }
   0xf   :  { %p1001_p6 = por %p1000_p5, %p999_p4 }
  0x11   :  { %p1002_p7 = pnand %p1001_p6, %p995_p3 }
  0x13   :  { %1005 = shalt.err (!%p1002_p7)
}
  0x14   :  { %s1160_s13 = smov 128   ;;  %s1161_s14 = smov 8  }
  0x15   :  { %40 = dma.hbm_to_vmem [thread:$0]  %s1350_s1, 384, %s35_s25, [#allocation8], %s1160_s13, %s1160_s13, %s1161_s14  }
  0x16   :  { %s1006_s19 = scalar_lea.hbm %s1352_s3, 384 }
  0x17   :  { %p1007_p8 = scmp.ne.s32.totalorder %s1352_s3, %s1006_s19  ;;  %p1010_p9 = scmp.lt.u32.totalorder %s1006_s19, %s1352_s3 }
  0x19   :  { %p1012_p10 = pnand %p1010_p9, %p1007_p8 }
  0x1b   :  { %1015 = shalt.err (!%p1012_p10)
}
  0x1c   :  { %s1016_s24 = scalar_lea.vmem %s1213_s27, 384  ;;  %p1021_p12 = scmp.lt.s32.totalorder %s1213_s27, %s1213_s27 }
  0x1d   :  { %p1017_p11 = scmp.ne.s32.totalorder %s1213_s27, %s1016_s24  ;;  %p1022_p13 = scmp.lt.s32.totalorder %s1016_s24, %s1016_s24 }
  0x1f   :  { %p1023_p0 = por %p1022_p13, %p1021_p12 }
  0x21   :  { %p1024_p1 = pnand %p1023_p0, %p1017_p11 }
  0x23   :  { %1027 = shalt.err (!%p1024_p1)
}
  0x24   :  { %64 = dma.hbm_to_vmem [thread:$0]  %s1352_s3, 384, %s1213_s27, [#allocation11], %s1160_s13, %s1160_s13, %s1161_s14  }
  0x25   :  { %s1162_s26 = smov [#allocation13]   ;;  %s1028_s8 = scalar_lea.hbm %s1354_s5, 1024 }
  0x26   :  { %s82_s28 = sshll.u32 %s1162_s26, 4  ;;  %p1029_p2 = scmp.ne.s32.totalorder %s1354_s5, %s1028_s8  ;;  %s83_s28 = int_to_ptr.vmem [resolvable:$true] %s82_s28 }
  0x27   :  { %p1032_p3 = scmp.lt.u32.totalorder %s1028_s8, %s1354_s5 }
  0x29   :  { %p1034_p4 = pnand %p1032_p3, %p1029_p2 }
  0x2b   :  { %1037 = shalt.err (!%p1034_p4)
}
  0x2c   :  { %s1038_s15 = scalar_lea.vmem %s83_s28, 1024  ;;  %p1043_p6 = scmp.lt.s32.totalorder %s83_s28, %s83_s28 }
  0x2d   :  { %p1039_p5 = scmp.ne.s32.totalorder %s83_s28, %s1038_s15  ;;  %p1044_p7 = scmp.lt.s32.totalorder %s1038_s15, %s1038_s15 }
  0x2f   :  { %p1045_p8 = por %p1044_p7, %p1043_p6 }
  0x31   :  { %p1046_p9 = pnand %p1045_p8, %p1039_p5 }
  0x33   :  { %1049 = shalt.err (!%p1046_p9)
}
  0x34   :  { %s1163_s3 = smov 64   ;;  %s1164_s27 = smov 4  }
  0x35   :  { %88 = dma.hbm_to_vmem [thread:$0]  %s1354_s5, 1024, %s83_s28, [#allocation14], %s1163_s3, %s1163_s3, %s1164_s27  }
  0x36   :  { %s1165_s18 = smov [#allocation4]   ;;  %s1166_s20 = smov [#allocation9]  }
  0x37   :  { %s22_s19 = sshll.u32 %s1165_s18, 4  ;;  %s46_s21 = sshll.u32 %s1166_s20, 4  ;;  %s23_s19 = int_to_ptr.vmem [resolvable:$true] %s22_s19  ;;  %s47_s21 = int_to_ptr.vmem [resolvable:$true] %s46_s21 }
  0x38   :  { %s1050_s24 = scalar_lea.hbm %s1349_s0, 384 }
  0x39   :  { %p1051_p10 = scmp.ne.s32.totalorder %s1349_s0, %s1050_s24  ;;  %p1054_p11 = scmp.lt.u32.totalorder %s1050_s24, %s1349_s0 }
  0x3b   :  { %p1056_p12 = pnand %p1054_p11, %p1051_p10 }
  0x3d   :  { %1059 = shalt.err (!%p1056_p12)
}
  0x3e   :  { %s1060_s5 = scalar_lea.vmem %s23_s19, 384  ;;  %p1065_p0 = scmp.lt.s32.totalorder %s23_s19, %s23_s19 }
  0x3f   :  { %p1061_p13 = scmp.ne.s32.totalorder %s23_s19, %s1060_s5  ;;  %p1066_p1 = scmp.lt.s32.totalorder %s1060_s5, %s1060_s5 }
  0x41   :  { %p1067_p2 = por %p1066_p1, %p1065_p0 }
  0x43   :  { %p1068_p3 = pnand %p1067_p2, %p1061_p13 }
  0x45   :  { %1071 = shalt.err (!%p1068_p3)
}
  0x46   :  { %28 = dma.hbm_to_vmem [thread:$0]  %s1349_s0, 384, %s23_s19, [#allocation5], %s1160_s13, %s1160_s13, %s1161_s14  }
  0x47   :  { %s1072_s10 = scalar_lea.hbm %s1351_s2, 384 }
  0x48   :  { %p1073_p4 = scmp.ne.s32.totalorder %s1351_s2, %s1072_s10  ;;  %p1076_p5 = scmp.lt.u32.totalorder %s1072_s10, %s1351_s2 }
  0x4a   :  { %p1078_p6 = pnand %p1076_p5, %p1073_p4 }
  0x4c   :  { %1081 = shalt.err (!%p1078_p6)
}
  0x4d   :  { %s1082_s17 = scalar_lea.vmem %s47_s21, 384  ;;  %p1087_p8 = scmp.lt.s32.totalorder %s47_s21, %s47_s21 }
  0x4e   :  { %p1083_p7 = scmp.ne.s32.totalorder %s47_s21, %s1082_s17  ;;  %p1088_p9 = scmp.lt.s32.totalorder %s1082_s17, %s1082_s17 }
  0x50   :  { %p1089_p10 = por %p1088_p9, %p1087_p8 }
  0x52   :  { %p1090_p11 = pnand %p1089_p10, %p1083_p7 }
  0x54   :  { %1093 = shalt.err (!%p1090_p11)
}
  0x55   :  { %52 = dma.hbm_to_vmem [thread:$0]  %s1351_s2, 384, %s47_s21, [#allocation8], %s1160_s13, %s1160_s13, %s1161_s14  }
  0x56   :  { %s1167_s19 = smov [#allocation12]   ;;  %s1094_s24 = scalar_lea.hbm %s1353_s4, 3072 }
  0x57   :  { %s70_s20 = sshll.u32 %s1167_s19, 4  ;;  %p1095_p12 = scmp.ne.s32.totalorder %s1353_s4, %s1094_s24  ;;  %s71_s20 = int_to_ptr.vmem [resolvable:$true] %s70_s20 }
  0x58   :  { %p1098_p13 = scmp.lt.u32.totalorder %s1094_s24, %s1353_s4 }
  0x5a   :  { %p1100_p0 = pnand %p1098_p13, %p1095_p12 }
  0x5c   :  { %1103 = shalt.err (!%p1100_p0)
}
  0x5d   :  { %s1104_s5 = scalar_lea.vmem %s71_s20, 3072  ;;  %p1109_p2 = scmp.lt.s32.totalorder %s71_s20, %s71_s20 }
  0x5e   :  { %p1105_p1 = scmp.ne.s32.totalorder %s71_s20, %s1104_s5  ;;  %p1110_p3 = scmp.lt.s32.totalorder %s1104_s5, %s1104_s5 }
  0x60   :  { %p1111_p4 = por %p1110_p3, %p1109_p2 }
  0x62   :  { %p1112_p5 = pnand %p1111_p4, %p1105_p1 }
  0x64   :  { %1115 = shalt.err (!%p1112_p5)
}
  0x65   :  { %s1168_s2 = smov 192   ;;  %s1169_s13 = smov 12  }
  0x66   :  { %76 = dma.hbm_to_vmem [thread:$0]  %s1353_s4, 3072, %s71_s20, [#allocation11], %s1168_s2, %s1168_s2, %s1169_s13  }
  0x67   :  { %s1170_s28 = smov [#allocation15]   ;;  %s1116_s10 = scalar_lea.hbm %s1355_s6, 1024 }
  0x68   :  { %s94_s30 = sshll.u32 %s1170_s28, 4  ;;  %p1117_p6 = scmp.ne.s32.totalorder %s1355_s6, %s1116_s10  ;;  %s95_s30 = int_to_ptr.vmem [resolvable:$true] %s94_s30 }
  0x69   :  { %p1120_p7 = scmp.lt.u32.totalorder %s1116_s10, %s1355_s6 }
  0x6b   :  { %p1122_p8 = pnand %p1120_p7, %p1117_p6 }
  0x6d   :  { %1125 = shalt.err (!%p1122_p8)
}
  0x6e   :  { %s1126_s17 = scalar_lea.vmem %s95_s30, 1024  ;;  %p1131_p10 = scmp.lt.s32.totalorder %s95_s30, %s95_s30 }
  0x6f   :  { %p1127_p9 = scmp.ne.s32.totalorder %s95_s30, %s1126_s17  ;;  %p1132_p11 = scmp.lt.s32.totalorder %s1126_s17, %s1126_s17 }
  0x71   :  { %p1133_p12 = por %p1132_p11, %p1131_p10 }
  0x73   :  { %p1134_p13 = pnand %p1133_p12, %p1127_p9 }
  0x75   :  { %1137 = shalt.err (!%p1134_p13)
}
  0x76   :  { %100 = dma.hbm_to_vmem [thread:$0]  %s1355_s6, 1024, %s95_s30, [#allocation14], %s1163_s3, %s1163_s3, %s1164_s27  }
  0x77   :  { %1148 = dma.done.wait [#allocation5], 384  }
  0x78   :  { %1149 = vsyncadd [#allocation5], 4294966912 }
  0x79   :  { %1150 = dma.done.wait [#allocation8], 768  }
  0x7a   :  { %1151 = vsyncadd [#allocation8], 4294966528 }
  0x7b   :  { %1152 = dma.done.wait [#allocation11], 3456  }
  0x7c   :  { %1153 = vsyncadd [#allocation11], 4294963840 }
  0x7d   :  { %1154 = dma.done.wait [#allocation14], 2048  }
  0x7e   :  { %1155 = vsyncadd [#allocation14], 4294965248  ;;  %v1171_v0 = vmov 0   ;;  %v934_v1 = vld [vmem:[#allocation12 + $0x4] ss:$12 sps:$4 sm:$0xff]   ;;  %v1325_v20 = vld [vmem:[#allocation4 + $0x8] sm:$0xff] }
  0x7f   :  { %330 = vmatprep.mubr.bf16.mxu0 %v1171_v0  ;;  %v936_v2 = vld [vmem:[#allocation12 + $0x8] ss:$12 sps:$4 sm:$0xff]   ;;  %298 = vmatprep.subr.bf16.mxu0 %v934_v1  ;;  %v937_v3 = vld [vmem:[#allocation12] ss:$12 sps:$4 sm:$0xff]   ;;  %v941_v6 = vld [vmem:[#allocation12 + $0x18] ss:$12 sps:$4 sm:$0xff]  }
  0x80   :  { %853 = vmatprep.subr.bf16.mxu1 %v936_v2  ;;  %v938_v4 = vld [vmem:[#allocation12 + $0x1c] ss:$12 sps:$4 sm:$0xff]   ;;  %299 = vmatpush1.bf16.msra.mxu0 %v937_v3  ;;  %v940_v5 = vld [vmem:[#allocation12 + $0x20] ss:$12 sps:$4 sm:$0xff]   ;;  %v944_v8 = vld [vmem:[#allocation12 + $0x38] ss:$12 sps:$4 sm:$0xff]  }
  0x81   :  { %854 = vmatpush3.bf16.msra.mxu1 %v936_v2  ;;  %300 = vmatprep.subr.bf16.mxu0 %v938_v4  ;;  %v942_v7 = vld [vmem:[#allocation12 + $0x34] ss:$12 sps:$4 sm:$0xff]   ;;  %v945_v9 = vld [vmem:[#allocation12 + $0x30] ss:$12 sps:$4 sm:$0xff]   ;;  %v946_v10 = vld [vmem:[#allocation12 + $0x4c] ss:$12 sps:$4 sm:$0xff]  }
  0x82   :  { %855 = vmatprep.subr.bf16.mxu1 %v940_v5  ;;  %v948_v11 = vld [vmem:[#allocation12 + $0x50] ss:$12 sps:$4 sm:$0xff]   ;;  %v949_v12 = vld [vmem:[#allocation12 + $0x48] ss:$12 sps:$4 sm:$0xff]   ;;  %v953_v15 = vld [vmem:[#allocation12 + $0x60] ss:$12 sps:$4 sm:$0xff]  }
  0x83   :  { %v950_v13 = vld [vmem:[#allocation12 + $0x64] ss:$12 sps:$4 sm:$0xff]   ;;  %v952_v14 = vld [vmem:[#allocation12 + $0x68] ss:$12 sps:$4 sm:$0xff]   ;;  %v956_v17 = vld [vmem:[#allocation12 + $0x80] ss:$12 sps:$4 sm:$0xff]  }
  0x84   :  { %301 = vmatpush1.bf16.msra.mxu0 %v941_v6  ;;  %v954_v16 = vld [vmem:[#allocation12 + $0x7c] ss:$12 sps:$4 sm:$0xff]   ;;  %v1323_v18 = vld [vmem:[#allocation4] sm:$0xff]  ;;  %v962_v25 = vld [vmem:[#allocation12 + $0xac] ss:$12 sps:$4 sm:$0xff]   ;;  %s1138_s29 = scalar_lea.hbm %s1356_s7, 16 }
  0x85   :  { %856 = vmatpush3.bf16.msra.mxu1 %v940_v5  ;;  %302 = vmatprep.subr.bf16.mxu0 %v942_v7  ;;  %v957_v19 = vld [vmem:[#allocation12 + $0x78] ss:$12 sps:$4 sm:$0xff]   ;;  %v958_v21 = vld [vmem:[#allocation12 + $0x94] ss:$12 sps:$4 sm:$0xff]   ;;  %v136_v22 = vpack.c.bf16 %v1325_v20, %v1323_v18  ;;  %v961_v24 = vld [vmem:[#allocation12 + $0x90] ss:$12 sps:$4 sm:$0xff]   ;;  %p1139_p0 = scmp.ne.s32.totalorder %s1356_s7, %s1138_s29  ;;  %p1142_p1 = scmp.lt.u32.totalorder %s1138_s29, %s1356_s7 }
  0x86   :  { %857 = vmatprep.subr.bf16.mxu1 %v944_v8  ;;  %v960_v23 = vld [vmem:[#allocation12 + $0x98] ss:$12 sps:$4 sm:$0xff]   ;;  %v964_v26 = vld [vmem:[#allocation12 + $0xb0] ss:$12 sps:$4 sm:$0xff]   ;;  %v965_v27 = vld [vmem:[#allocation12 + $0xa8] ss:$12 sps:$4 sm:$0xff]  }
  0x87   :  { %869 = vmatprep.mubr.bf16.mxu1 %v136_v22  ;;  %v1329_v28 = vld [vmem:[#allocation4 + $0x10] sm:$0xff]  ;;  %v966_v29 = vld [vmem:[#allocation13] sm:$0xff]   ;;  %v967_v32 = vld [vmem:[#allocation13 + $0x8] sm:$0xff]   ;;  %p1144_p2 = pnand %p1142_p1, %p1139_p0 }
  0x88   :  { %303 = vmatpush1.bf16.msra.mxu0 %v945_v9  ;;  %v968_v30 = vld [vmem:[#allocation15] sm:$0xff]   ;;  %v137_v31 = vpack.c.bf16 %v1329_v28, %v1329_v28  ;;  %v970_v33 = vld [vmem:[#allocation15 + $0x8] sm:$0xff]   ;;  %v969_v34 = vld [vmem:[#allocation13 + $0x10] sm:$0xff]  }
  0x89   :  { %858 = vmatpush3.bf16.msra.mxu1 %v944_v8  ;;  %304 = vmatprep.subr.bf16.mxu0 %v946_v10  ;;  %v971_v35 = vld [vmem:[#allocation13 + $0x18] sm:$0xff]   ;;  %v972_v36 = vld [vmem:[#allocation15 + $0x10] sm:$0xff]   ;;  %v973_v37 = vld [vmem:[#allocation13 + $0x20] sm:$0xff]  }
  0x8a   :  { %859 = vmatprep.subr.bf16.mxu1 %v948_v11  ;;  %v974_v38 = vld [vmem:[#allocation15 + $0x18] sm:$0xff]   ;;  %v975_v39 = vld [vmem:[#allocation13 + $0x28] sm:$0xff]   ;;  %v976_v40 = vld [vmem:[#allocation15 + $0x20] sm:$0xff]  }
  0x8b   :  { %v977_v41 = vld [vmem:[#allocation13 + $0x30] sm:$0xff]   ;;  %v978_v42 = vld [vmem:[#allocation15 + $0x28] sm:$0xff]   ;;  %v979_v43 = vld [vmem:[#allocation13 + $0x38] sm:$0xff]  }
  0x8c   :  { %305 = vmatpush1.bf16.msra.mxu0 %v949_v12  ;;  %v980_v44 = vld [vmem:[#allocation15 + $0x30] sm:$0xff]   ;;  %v981_v45 = vld [vmem:[#allocation15 + $0x38] sm:$0xff]   ;;  %v669_v12 = vld [vmem:[#allocation7 + $0x8] sm:$0xff] }
  0x8d   :  { %860 = vmatpush3.bf16.msra.mxu1 %v948_v11  ;;  %306 = vmatprep.subr.bf16.mxu0 %v950_v13  ;;  %v668_v11 = vld [vmem:[#allocation7] sm:$0xff] }
  0x8e   :  { %861 = vmatprep.subr.bf16.mxu1 %v952_v14 }
  0x90   :  { %307 = vmatpush1.bf16.msra.mxu0 %v953_v15  ;;  %v675_v15 = vsub.f32 %v1325_v20, %v669_v12 }
  0x91   :  { %862 = vmatpush3.bf16.msra.mxu1 %v952_v14  ;;  %308 = vmatprep.subr.bf16.mxu0 %v954_v16  ;;  %v674_v14 = vsub.f32 %v1323_v18, %v668_v11 }
  0x92   :  { %863 = vmatprep.subr.bf16.mxu1 %v956_v17 }
  0x94   :  { %309 = vmatpush1.bf16.msra.mxu0 %v957_v19 }
  0x95   :  { %864 = vmatpush3.bf16.msra.mxu1 %v956_v17  ;;  %310 = vmatprep.subr.bf16.mxu0 %v958_v21  ;;  %v670_v17 = vld [vmem:[#allocation7 + $0x10] sm:$0xff] }
  0x96   :  { %865 = vmatprep.subr.bf16.mxu1 %v960_v23  ;;  %v676_v21 = vsub.f32 %v1329_v28, %v670_v17  ;;  %v672_v28 = vld [vmem:[#allocation9 + $0x8] sm:$0xff] }
  0x98   :  { %311 = vmatpush1.bf16.msra.mxu0 %v961_v24  ;;  %v647_v24 = vld [vmem:[#allocation10] sm:$0xff] }
  0x99   :  { %866 = vmatpush3.bf16.msra.mxu1 %v960_v23  ;;  %312 = vmatprep.subr.bf16.mxu0 %v962_v25  ;;  %v678_v23 = vmul.f32 %v675_v15, %v675_v15 }
  0x9a   :  { %867 = vmatprep.subr.bf16.mxu1 %v964_v26 }
  0x9c   :  { %313 = vmatpush1.bf16.msra.mxu0 %v965_v27 }
  0x9d   :  { %868 = vmatpush3.bf16.msra.mxu1 %v964_v26  ;;  %873 = vmatprep.subr.bf16.mxu0 %v966_v29  ;;  %v648_v26 = vld [vmem:[#allocation10 + $0x8] sm:$0xff] }
  0x9e   :  { %893 = vmatprep.subr.bf16.mxu1 %v968_v30 }
  0x9f   :  { %331 = vmatmul.mubr.bf16.vlgmr.msra.gmra.mrb[0].mxu0 %v136_v22 }
  0xa0   :  { %870 = vmatmul.mubr.bf16.vlgmr.msra.gmra.mrb[0].mxu1 %v137_v31  ;;  %340 = vmatprep.mubr.bf16.mxu0 %v1171_v0 }
  0xa1   :  { %874 = vmatpush3.bf16.msra.mxu0 %v966_v29  ;;  %894 = vmatpush3.bf16.msra.mxu1 %v968_v30  ;;  %v679_v30 = vmul.f32 %v676_v21, %v676_v21 }
  0xa2   :  { %875 = vmatprep.subr.bf16.mxu0 %v967_v32  ;;  %895 = vmatprep.subr.bf16.mxu1 %v970_v33 }
  0xa3   :  { %909 = vmatprep.mubr.bf16.mxu1 %v136_v22  ;;  %v677_v22 = vmul.f32 %v674_v14, %v674_v14 }
  0xa5   :  { %876 = vmatpush3.bf16.msra.mxu0 %v967_v32  ;;  %896 = vmatpush3.bf16.msra.mxu1 %v970_v33  ;;  %v649_v32 = vld [vmem:[#allocation10 + $0x10] sm:$0xff] }
  0xa6   :  { %877 = vmatprep.subr.bf16.mxu0 %v969_v34  ;;  %897 = vmatprep.subr.bf16.mxu1 %v972_v36 }
  0xa7   :  { %341 = vmatmul.mubr.bf16.gmra.mrb[4].mxu0 %v137_v31 }
  0xa9   :  { %878 = vmatpush3.bf16.msra.mxu0 %v969_v34  ;;  %898 = vmatpush3.bf16.msra.mxu1 %v972_v36 }
  0xaa   :  { %879 = vmatprep.subr.bf16.mxu0 %v971_v35  ;;  %899 = vmatprep.subr.bf16.mxu1 %v974_v38 }
  0xad   :  { %880 = vmatpush3.bf16.msra.mxu0 %v971_v35  ;;  %900 = vmatpush3.bf16.msra.mxu1 %v974_v38  ;;  %v671_v38 = vld [vmem:[#allocation9] sm:$0xff] }
  0xae   :  { %881 = vmatprep.subr.bf16.mxu0 %v973_v37  ;;  %901 = vmatprep.subr.bf16.mxu1 %v976_v40 }
  0xb1   :  { %882 = vmatpush3.bf16.msra.mxu0 %v973_v37  ;;  %902 = vmatpush3.bf16.msra.mxu1 %v976_v40  ;;  %v719_v40 = vmul.f32 %v672_v28, %v672_v28 }
  0xb2   :  { %883 = vmatprep.subr.bf16.mxu0 %v975_v39  ;;  %903 = vmatprep.subr.bf16.mxu1 %v978_v42 }
  0xb5   :  { %884 = vmatpush3.bf16.msra.mxu0 %v975_v39  ;;  %904 = vmatpush3.bf16.msra.mxu1 %v978_v42  ;;  %v718_v39 = vmul.f32 %v671_v38, %v671_v38  ;;  %v673_v42 = vld [vmem:[#allocation9 + $0x10] sm:$0xff] }
  0xb6   :  { %885 = vmatprep.subr.bf16.mxu0 %v977_v41  ;;  %905 = vmatprep.subr.bf16.mxu1 %v980_v44 }
  0xb9   :  { %886 = vmatpush3.bf16.msra.mxu0 %v977_v41  ;;  %906 = vmatpush3.bf16.msra.mxu1 %v980_v44 }
  0xba   :  { %887 = vmatprep.subr.bf16.mxu0 %v979_v43  ;;  %907 = vmatprep.subr.bf16.mxu1 %v981_v45 }
  0xbd   :  { %888 = vmatpush3.bf16.msra.mxu0 %v979_v43  ;;  %908 = vmatpush3.bf16.msra.mxu1 %v981_v45  ;;  %v721_v43 = vmul.f32 %v673_v42, %v673_v42  ;;  %v720_v45 = vadd.f32 %v719_v40, %v718_v39 }
  0xc0   :  { %910 = vmatmul.mubr.bf16.vlgmr.msra.gmra.mrb[4].mxu1 %v137_v31  ;;  %v680_v31 = vadd.f32 %v678_v23, %v677_v22 }
  0xc2   :  { %v681_v35 = vadd.f32 %v680_v31, %v679_v30 }
  0xc4   :  { %682 = vadd.xlane.f32.xlu0 %v681_v35 }
 0x172   :  { %v332_v46 = vpop.f32.mrb[0].mxu0 }
 0x173   :  { %v871_v47 = vpop.f32.mrb[0].mxu1  ;;  %v334_v48 = vpop.f32.mrb[1].mxu0 }
 0x174   :  { %v383_v49 = vpop.f32.mrb[1].mxu1  ;;  %v397_v50 = vsub.f32 %v334_v48, %v332_v46  ;;  %v336_v52 = vpop.f32.mrb[2].mxu0 }
 0x175   :  { %v400_v51 = vsub.f32 %v383_v49, %v332_v46  ;;  %v872_v53 = vpop.f32.mrb[2].mxu1  ;;  %v338_v54 = vpop.f32.mrb[3].mxu0 }
 0x176   :  { %v386_v55 = vpop.f32.mrb[3].mxu1  ;;  %v398_v56 = vsub.f32 %v338_v54, %v336_v52 }
 0x177   :  { %v401_v57 = vsub.f32 %v386_v55, %v336_v52  ;;  %v722_v52 = vadd.f32 %v721_v43, %v720_v45 }
 0x178   :  { %v410_v58 = vmul.f32 %v400_v51, %v398_v56 }
 0x179   :  { %v409_v59 = vmul.f32 %v401_v57, %v397_v50 }
 0x17a   :  { %v342_v61 = vpop.f32.mrb[4].mxu0 }
 0x17b   :  { %v411_v60 = vsub.f32 %v409_v59, %v410_v58  ;;  %v402_v62 = vsub.f32 %v871_v47, %v342_v61  ;;  %v344_v63 = vpop.f32.mrb[5].mxu0 }
 0x17c   :  { %v399_v0 = vsub.f32 %v344_v63, %v342_v61  ;;  %v346_v1 = vpop.f32.mrb[6].mxu0  ;;  %v727_v61 = vlaneseq }
 0x17d   :  { %v403_v2 = vmul.f32 %v402_v62, %v398_v56  ;;  %v407_v3 = vmul.f32 %v402_v62, %v397_v50  ;;  %v347_v4 = vpop.f32.mrb[7].mxu0  ;;  %v416_v10 = vpack.c.bf16 %v411_v60, %v411_v60 }
 0x17e   :  { %v404_v5 = vmul.f32 %v401_v57, %v399_v0  ;;  %v406_v6 = vmul.f32 %v400_v51, %v399_v0  ;;  %v728_v62 = vshrl.u32 %v727_v61, 7  ;;  %v731_v63 = vand.u32 127, %v727_v61 }
 0x180   :  { %v405_v7 = vsub.f32 %v403_v2, %v404_v5  ;;  %v408_v8 = vsub.f32 %v406_v6, %v407_v3  ;;  %vm729_vm0 = vcmp.lt.s32.totalorder %v728_v62, 2  ;;  %vm732_vm1 = vcmp.lt.s32.totalorder %v731_v63, 42  ;;  %v683_v3 = vpop.xlane.xlu0 %682 }
 0x181   :  { %vm733_vm2 = vmand %vm729_vm0, %vm732_vm1  ;;  %v684_v5 = vrot.slane %v683_v3, 4 }
 0x182   :  { %v415_v9 = vpack.c.bf16 %v408_v8, %v405_v7 }
 0x183   :  { %v685_v6 = vadd.f32 %v684_v5, %v683_v3 }
 0x184   :  { %889 = vmatprep.mubr.bf16.mxu0 %v415_v9 }
 0x185   :  { %890 = vmatmul.mubr.bf16.vlgmr.msra.gmra.mrb[8].mxu0 %v416_v10  ;;  %v686_v9 = vrot.slane %v685_v6, 2 }
 0x193   :  { %v911_v13 = vpop.f32.mrb[4].mxu1 }
 0x194   :  { %v633_v16 = vpop.f32.mrb[5].mxu1  ;;  %v652_v33 = vsub.f32 %v911_v13, %v649_v32  ;;  %v687_v13 = vadd.f32 %v686_v9, %v685_v6 }
 0x195   :  { %v912_v19 = vpop.f32.mrb[6].mxu1  ;;  %v650_v27 = vsub.f32 %v633_v16, %v647_v24 }
 0x196   :  { %v636_v25 = vpop.f32.mrb[7].mxu1  ;;  %v658_v20 = vmul.f32 %v652_v33, %v652_v33  ;;  %v688_v14 = vrot.slane %v687_v13, 1 }
 0x197   :  { %v651_v29 = vsub.f32 %v636_v25, %v648_v26  ;;  %v656_v34 = vmul.f32 %v650_v27, %v650_v27 }
 0x198   :  { %v689_v16 = vadd.f32 %v688_v14, %v687_v13 }
 0x199   :  { %v657_v18 = vmul.f32 %v651_v29, %v651_v29 }
 0x19a   :  { %913 = vpush %v689_v16 }
 0x19b   :  { %v694_v36 = vadd.f32 %v657_v18, %v656_v34 }
 0x19d   :  { %v695_v37 = vadd.f32 %v694_v36, %v658_v20 }
 0x19f   :  { %696 = vadd.xlane.f32.xlu0 %v695_v37 }
 0x1cb   :  { %s914_s6 = spop %913 }
 0x1cc   :  { %s747_s3 = smul.f32 0.003968254, %s914_s6 }
 0x1ce   :  { %759 = sst [smem:[#allocation16]] %s747_s3 }
 0x22c   :  { %v697_v7 = vpop.xlane.xlu0 %696 }
 0x22d   :  { %v698_v8 = vrot.slane %v697_v7, 4 }
 0x22f   :  { %v699_v10 = vadd.f32 %v698_v8, %v697_v7 }
 0x231   :  { %v700_v11 = vrot.slane %v699_v10, 2 }
 0x233   :  { %v701_v12 = vadd.f32 %v700_v11, %v699_v10 }
 0x235   :  { %v702_v15 = vrot.slane %v701_v12, 1 }
 0x237   :  { %v703_v17 = vadd.f32 %v702_v15, %v701_v12 }
 0x239   :  { %915 = vpush %v703_v17 }
 0x258   :  { %v891_v41 = vpop.f32.mrb[8].mxu0 }
 0x259   :  { %v515_v44 = vpop.f32.mrb[9].mxu0  ;;  %v710_v53 = vmul.f32 %v891_v41, %v673_v42  ;;  %v716_v54 = vmul.f32 %v891_v41, %v891_v41 }
 0x25a   :  { %v892_v46 = vpop.f32.mrb[10].mxu0  ;;  %v708_v48 = vmul.f32 %v671_v38, %v515_v44  ;;  %v713_v49 = vmul.f32 %v515_v44, %v515_v44 }
 0x25b   :  { %v518_v47 = vpop.f32.mrb[11].mxu0 }
 0x25c   :  { %v709_v50 = vmul.f32 %v672_v28, %v518_v47  ;;  %v714_v51 = vmul.f32 %v518_v47, %v518_v47 }
 0x25e   :  { %v711_v55 = vadd.f32 %v709_v50, %v708_v48  ;;  %v715_v56 = vadd.f32 %v714_v51, %v713_v49 }
 0x260   :  { %v717_v57 = vadd.f32 %v716_v54, %v715_v56  ;;  %v712_v58 = vadd.f32 %v711_v55, %v710_v53 }
 0x262   :  { %v723_v59 = vmul.f32 %v722_v52, %v717_v57 }
 0x264   :  { %v724_v60 = vmax.f32 %v723_v59, 1e-16 }
 0x266   :  { %982 = vrsqrt.f32 %v724_v60 }
 0x26a   :  { %s916_s27 = spop %915 }
 0x26b   :  { %s753_s18 = smul.f32 0.003968254, %s916_s27 }
 0x26d   :  { %763 = sst [smem:[#allocation16 + $0x2]] %s753_s18  ;;  %s756_s23 = smul.f32 0.5, %s753_s18 }
 0x270   :  { %v983_v0 = vpop.eup %982 }
 0x271   :  { %v726_v1 = vmul.f32 %v983_v0, %v712_v58 }
 0x273   :  { %v734_v2 = vsub.f32 1.0, %v726_v1 }
 0x275   :  { %v735_v4 = vsel %vm733_vm2, %v734_v2, 0.0 }
 0x276   :  { %736 = vadd.xlane.f32.xlu1 %v735_v4 }
 0x303   :  { %v737_v19 = vpop.xlane.xlu1 %736 }
 0x304   :  { %v738_v21 = vrot.slane %v737_v19, 4 }
 0x306   :  { %v739_v22 = vadd.f32 %v738_v21, %v737_v19 }
 0x308   :  { %v740_v23 = vrot.slane %v739_v22, 2 }
 0x30a   :  { %v741_v24 = vadd.f32 %v740_v23, %v739_v22 }
 0x30c   :  { %v742_v25 = vrot.slane %v741_v24, 1 }
 0x30e   :  { %v743_v26 = vadd.f32 %v742_v25, %v741_v24 }
 0x310   :  { %917 = vpush %v743_v26 }
 0x341   :  { %s918_s19 = spop %917 }
 0x342   :  { %s750_s20 = smul.f32 0.011904762, %s918_s19 }
 0x344   :  { %s754_s22 = smul.f32 0.1, %s750_s20  ;;  %761 = sst [smem:[#allocation16 + $0x1]] %s750_s20 }
 0x346   :  { %s755_s24 = sadd.f32 %s754_s22, %s747_s3 }
 0x348   :  { %s757_s1 = sadd.f32 %s756_s23, %s755_s24 }
 0x34a   :  { %765 = sst [smem:[#allocation16 + $0x3]] %s757_s1 }
 0x34b   :  { %1147 = shalt.err (!%p1144_p2)
}
 0x34c   :  { %s1172_s21 = smov [#allocation16]  }
 0x34d   :  { %773 = dma.smem_to_hbm %s1172_s21, 16, %s1356_s7, [#allocation6]  }
 0x34e   :  { %1156 = dma.done.wait [#allocation6], 16  }
 0x34f   :  { %1157 = vsyncadd [#allocation6], 4294967280 }
 0x350   :  { %777 = sfence }
 0x351   :  { %778 = vsyncpa [#allocation5], 1 }
 0x352   :  { %779 = vsyncpa [#allocation8], 1 }
 0x353   :  { %780 = vsyncpa [#allocation11], 1 }
 0x354   :  { %781 = vsyncpa [#allocation14], 1 }
 0x355   :  { %782 = vsyncpa [#allocation6], 1 }

// kernel: tpu_custom_call.1
= control target key start
LH: loop header
LB: loop body
LE: loop exit
PB: predicated region body
PF: predicated region fallthrough
CT: control target
= control target key end

     0   :  { %12 = vsyncpa [#allocation5], 0  ;;  %s1349_s0 = inlined_call_operand.hbm [shape: f32[24,128], index: 0, kind: input, shape index: {}]   ;;  %s1350_s1 = inlined_call_operand.hbm [shape: f32[24,128], index: 1, kind: input, shape index: {}]   ;;  %s1351_s2 = inlined_call_operand.hbm [shape: f32[24,128], index: 2, kind: input, shape index: {}]   ;;  %s1352_s3 = inlined_call_operand.hbm [shape: f32[24,128], index: 3, kind: input, shape index: {}]   ;;  %s1353_s4 = inlined_call_operand.hbm [shape: bf16[128,384], index: 4, kind: input, shape index: {}]   ;;  %s1354_s5 = inlined_call_operand.hbm [shape: bf16[128,128], index: 5, kind: input, shape index: {}]   ;;  %s1355_s6 = inlined_call_operand.hbm [shape: bf16[128,128], index: 6, kind: input, shape index: {}]   ;;  %s1356_s7 = inlined_call_operand.hbm [shape: f32[4], index: 7, kind: output, shape index: {}]  }
   0x1   :  { %13 = vsyncpa [#allocation8], 0 }
   0x2   :  { %14 = vsyncpa [#allocation11], 0 }
   0x3   :  { %15 = vsyncpa [#allocation14], 0 }
   0x4   :  { %16 = vsyncpa [#allocation6], 0  ;;  %s1158_s24 = smov [#allocation7]   ;;  %s1159_s26 = smov [#allocation10]  }
   0x5   :  { %s34_s25 = sshll.u32 %s1158_s24, 4  ;;  %s58_s27 = sshll.u32 %s1159_s26, 4  ;;  %s35_s25 = int_to_ptr.vmem [resolvable:$true] %s34_s25  ;;  %s1213_s27 = int_to_ptr.vmem [resolvable:$true] %s58_s27 }
   0x6   :  { %s984_s30 = scalar_lea.hbm %s1350_s1, 384 }
   0x7   :  { %p985_p0 = scmp.ne.s32.totalorder %s1350_s1, %s984_s30  ;;  %p988_p1 = scmp.lt.u32.totalorder %s984_s30, %s1350_s1 }
   0x9   :  { %p990_p2 = pnand %p988_p1, %p985_p0 }
   0xb   :  { %993 = shalt.err (!%p990_p2)
}
   0xc   :  { %s994_s12 = scalar_lea.vmem %s35_s25, 384  ;;  %p999_p4 = scmp.lt.s32.totalorder %s35_s25, %s35_s25 }
   0xd   :  { %p995_p3 = scmp.ne.s32.totalorder %s35_s25, %s994_s12  ;;  %p1000_p5 = scmp.lt.s32.totalorder %s994_s12, %s994_s12 }
   0xf   :  { %p1001_p6 = por %p1000_p5, %p999_p4 }
  0x11   :  { %p1002_p7 = pnand %p1001_p6, %p995_p3 }
  0x13   :  { %1005 = shalt.err (!%p1002_p7)
}
  0x14   :  { %s1160_s13 = smov 128   ;;  %s1161_s14 = smov 8  }
  0x15   :  { %40 = dma.hbm_to_vmem [thread:$0]  %s1350_s1, 384, %s35_s25, [#allocation8], %s1160_s13, %s1160_s13, %s1161_s14  }
  0x16   :  { %s1006_s19 = scalar_lea.hbm %s1352_s3, 384 }
  0x17   :  { %p1007_p8 = scmp.ne.s32.totalorder %s1352_s3, %s1006_s19  ;;  %p1010_p9 = scmp.lt.u32.totalorder %s1006_s19, %s1352_s3 }
  0x19   :  { %p1012_p10 = pnand %p1010_p9, %p1007_p8 }
  0x1b   :  { %1015 = shalt.err (!%p1012_p10)
}
  0x1c   :  { %s1016_s24 = scalar_lea.vmem %s1213_s27, 384  ;;  %p1021_p12 = scmp.lt.s32.totalorder %s1213_s27, %s1213_s27 }
  0x1d   :  { %p1017_p11 = scmp.ne.s32.totalorder %s1213_s27, %s1016_s24  ;;  %p1022_p13 = scmp.lt.s32.totalorder %s1016_s24, %s1016_s24 }
  0x1f   :  { %p1023_p0 = por %p1022_p13, %p1021_p12 }
  0x21   :  { %p1024_p1 = pnand %p1023_p0, %p1017_p11 }
  0x23   :  { %1027 = shalt.err (!%p1024_p1)
}
  0x24   :  { %64 = dma.hbm_to_vmem [thread:$0]  %s1352_s3, 384, %s1213_s27, [#allocation11], %s1160_s13, %s1160_s13, %s1161_s14  }
  0x25   :  { %s1162_s26 = smov [#allocation13]   ;;  %s1028_s8 = scalar_lea.hbm %s1354_s5, 1024 }
  0x26   :  { %s82_s28 = sshll.u32 %s1162_s26, 4  ;;  %p1029_p2 = scmp.ne.s32.totalorder %s1354_s5, %s1028_s8  ;;  %s83_s28 = int_to_ptr.vmem [resolvable:$true] %s82_s28 }
  0x27   :  { %p1032_p3 = scmp.lt.u32.totalorder %s1028_s8, %s1354_s5 }
  0x29   :  { %p1034_p4 = pnand %p1032_p3, %p1029_p2 }
  0x2b   :  { %1037 = shalt.err (!%p1034_p4)
}
  0x2c   :  { %s1038_s15 = scalar_lea.vmem %s83_s28, 1024  ;;  %p1043_p6 = scmp.lt.s32.totalorder %s83_s28, %s83_s28 }
  0x2d   :  { %p1039_p5 = scmp.ne.s32.totalorder %s83_s28, %s1038_s15  ;;  %p1044_p7 = scmp.lt.s32.totalorder %s1038_s15, %s1038_s15 }
  0x2f   :  { %p1045_p8 = por %p1044_p7, %p1043_p6 }
  0x31   :  { %p1046_p9 = pnand %p1045_p8, %p1039_p5 }
  0x33   :  { %1049 = shalt.err (!%p1046_p9)
}
  0x34   :  { %s1163_s3 = smov 64   ;;  %s1164_s27 = smov 4  }
  0x35   :  { %88 = dma.hbm_to_vmem [thread:$0]  %s1354_s5, 1024, %s83_s28, [#allocation14], %s1163_s3, %s1163_s3, %s1164_s27  }
  0x36   :  { %s1165_s18 = smov [#allocation4]   ;;  %s1166_s20 = smov [#allocation9]  }
  0x37   :  { %s22_s19 = sshll.u32 %s1165_s18, 4  ;;  %s46_s21 = sshll.u32 %s1166_s20, 4  ;;  %s23_s19 = int_to_ptr.vmem [resolvable:$true] %s22_s19  ;;  %s47_s21 = int_to_ptr.vmem [resolvable:$true] %s46_s21 }
  0x38   :  { %s1050_s24 = scalar_lea.hbm %s1349_s0, 384 }
  0x39   :  { %p1051_p10 = scmp.ne.s32.totalorder %s1349_s0, %s1050_s24  ;;  %p1054_p11 = scmp.lt.u32.totalorder %s1050_s24, %s1349_s0 }
  0x3b   :  { %p1056_p12 = pnand %p1054_p11, %p1051_p10 }
  0x3d   :  { %1059 = shalt.err (!%p1056_p12)
}
  0x3e   :  { %s1060_s5 = scalar_lea.vmem %s23_s19, 384  ;;  %p1065_p0 = scmp.lt.s32.totalorder %s23_s19, %s23_s19 }
  0x3f   :  { %p1061_p13 = scmp.ne.s32.totalorder %s23_s19, %s1060_s5  ;;  %p1066_p1 = scmp.lt.s32.totalorder %s1060_s5, %s1060_s5 }
  0x41   :  { %p1067_p2 = por %p1066_p1, %p1065_p0 }
  0x43   :  { %p1068_p3 = pnand %p1067_p2, %p1061_p13 }
  0x45   :  { %1071 = shalt.err (!%p1068_p3)
}
  0x46   :  { %28 = dma.hbm_to_vmem [thread:$0]  %s1349_s0, 384, %s23_s19, [#allocation5], %s1160_s13, %s1160_s13, %s1161_s14  }
  0x47   :  { %s1072_s10 = scalar_lea.hbm %s1351_s2, 384 }
  0x48   :  { %p1073_p4 = scmp.ne.s32.totalorder %s1351_s2, %s1072_s10  ;;  %p1076_p5 = scmp.lt.u32.totalorder %s1072_s10, %s1351_s2 }
  0x4a   :  { %p1078_p6 = pnand %p1076_p5, %p1073_p4 }
  0x4c   :  { %1081 = shalt.err (!%p1078_p6)
}
  0x4d   :  { %s1082_s17 = scalar_lea.vmem %s47_s21, 384  ;;  %p1087_p8 = scmp.lt.s32.totalorder %s47_s21, %s47_s21 }
  0x4e   :  { %p1083_p7 = scmp.ne.s32.totalorder %s47_s21, %s1082_s17  ;;  %p1088_p9 = scmp.lt.s32.totalorder %s1082_s17, %s1082_s17 }
  0x50   :  { %p1089_p10 = por %p1088_p9, %p1087_p8 }
  0x52   :  { %p1090_p11 = pnand %p1089_p10, %p1083_p7 }
  0x54   :  { %1093 = shalt.err (!%p1090_p11)
}
  0x55   :  { %52 = dma.hbm_to_vmem [thread:$0]  %s1351_s2, 384, %s47_s21, [#allocation8], %s1160_s13, %s1160_s13, %s1161_s14  }
  0x56   :  { %s1167_s19 = smov [#allocation12]   ;;  %s1094_s24 = scalar_lea.hbm %s1353_s4, 3072 }
  0x57   :  { %s70_s20 = sshll.u32 %s1167_s19, 4  ;;  %p1095_p12 = scmp.ne.s32.totalorder %s1353_s4, %s1094_s24  ;;  %s71_s20 = int_to_ptr.vmem [resolvable:$true] %s70_s20 }
  0x58   :  { %p1098_p13 = scmp.lt.u32.totalorder %s1094_s24, %s1353_s4 }
  0x5a   :  { %p1100_p0 = pnand %p1098_p13, %p1095_p12 }
  0x5c   :  { %1103 = shalt.err (!%p1100_p0)
}
  0x5d   :  { %s1104_s5 = scalar_lea.vmem %s71_s20, 3072  ;;  %p1109_p2 = scmp.lt.s32.totalorder %s71_s20, %s71_s20 }
  0x5e   :  { %p1105_p1 = scmp.ne.s32.totalorder %s71_s20, %s1104_s5  ;;  %p1110_p3 = scmp.lt.s32.totalorder %s1104_s5, %s1104_s5 }
  0x60   :  { %p1111_p4 = por %p1110_p3, %p1109_p2 }
  0x62   :  { %p1112_p5 = pnand %p1111_p4, %p1105_p1 }
  0x64   :  { %1115 = shalt.err (!%p1112_p5)
}
  0x65   :  { %s1168_s2 = smov 192   ;;  %s1169_s13 = smov 12  }
  0x66   :  { %76 = dma.hbm_to_vmem [thread:$0]  %s1353_s4, 3072, %s71_s20, [#allocation11], %s1168_s2, %s1168_s2, %s1169_s13  }
  0x67   :  { %s1170_s28 = smov [#allocation15]   ;;  %s1116_s10 = scalar_lea.hbm %s1355_s6, 1024 }
  0x68   :  { %s94_s30 = sshll.u32 %s1170_s28, 4  ;;  %p1117_p6 = scmp.ne.s32.totalorder %s1355_s6, %s1116_s10  ;;  %s95_s30 = int_to_ptr.vmem [resolvable:$true] %s94_s30 }
  0x69   :  { %p1120_p7 = scmp.lt.u32.totalorder %s1116_s10, %s1355_s6 }
  0x6b   :  { %p1122_p8 = pnand %p1120_p7, %p1117_p6 }
  0x6d   :  { %1125 = shalt.err (!%p1122_p8)
}
  0x6e   :  { %s1126_s17 = scalar_lea.vmem %s95_s30, 1024  ;;  %p1131_p10 = scmp.lt.s32.totalorder %s95_s30, %s95_s30 }
  0x6f   :  { %p1127_p9 = scmp.ne.s32.totalorder %s95_s30, %s1126_s17  ;;  %p1132_p11 = scmp.lt.s32.totalorder %s1126_s17, %s1126_s17 }
  0x71   :  { %p1133_p12 = por %p1132_p11, %p1131_p10 }
  0x73   :  { %p1134_p13 = pnand %p1133_p12, %p1127_p9 }
  0x75   :  { %1137 = shalt.err (!%p1134_p13)
}
  0x76   :  { %100 = dma.hbm_to_vmem [thread:$0]  %s1355_s6, 1024, %s95_s30, [#allocation14], %s1163_s3, %s1163_s3, %s1164_s27  }
  0x77   :  { %1148 = dma.done.wait [#allocation5], 384  }
  0x78   :  { %1149 = vsyncadd [#allocation5], 4294966912 }
  0x79   :  { %1150 = dma.done.wait [#allocation8], 768  }
  0x7a   :  { %1151 = vsyncadd [#allocation8], 4294966528 }
  0x7b   :  { %1152 = dma.done.wait [#allocation11], 3456  }
  0x7c   :  { %1153 = vsyncadd [#allocation11], 4294963840 }
  0x7d   :  { %1154 = dma.done.wait [#allocation14], 2048  }
  0x7e   :  { %1155 = vsyncadd [#allocation14], 4294965248  ;;  %v1171_v0 = vmov 0   ;;  %v934_v1 = vld [vmem:[#allocation12 + $0x4] ss:$12 sps:$4 sm:$0xff]   ;;  %v1325_v20 = vld [vmem:[#allocation4 + $0x8] sm:$0xff] }
  0x7f   :  { %330 = vmatprep.mubr.bf16.mxu0 %v1171_v0  ;;  %v936_v2 = vld [vmem:[#allocation12 + $0x8] ss:$12 sps:$4 sm:$0xff]   ;;  %298 = vmatprep.subr.bf16.mxu0 %v934_v1  ;;  %v937_v3 = vld [vmem:[#allocation12] ss:$12 sps:$4 sm:$0xff]   ;;  %v941_v6 = vld [vmem:[#allocation12 + $0x18] ss:$12 sps:$4 sm:$0xff]  }
  0x80   :  { %853 = vmatprep.subr.bf16.mxu1 %v936_v2  ;;  %v938_v4 = vld [vmem:[#allocation12 + $0x1c] ss:$12 sps:$4 sm:$0xff]   ;;  %299 = vmatpush1.bf16.msra.mxu0 %v937_v3  ;;  %v940_v5 = vld [vmem:[#allocation12 + $0x20] ss:$12 sps:$4 sm:$0xff]   ;;  %v944_v8 = vld [vmem:[#allocation12 + $0x38] ss:$12 sps:$4 sm:$0xff]  }
  0x81   :  { %854 = vmatpush3.bf16.msra.mxu1 %v936_v2  ;;  %300 = vmatprep.subr.bf16.mxu0 %v938_v4  ;;  %v942_v7 = vld [vmem:[#allocation12 + $0x34] ss:$12 sps:$4 sm:$0xff]   ;;  %v945_v9 = vld [vmem:[#allocation12 + $0x30] ss:$12 sps:$4 sm:$0xff]   ;;  %v946_v10 = vld [vmem:[#allocation12 + $0x4c] ss:$12 sps:$4 sm:$0xff]  }
  0x82   :  { %855 = vmatprep.subr.bf16.mxu1 %v940_v5  ;;  %v948_v11 = vld [vmem:[#allocation12 + $0x50] ss:$12 sps:$4 sm:$0xff]   ;;  %v949_v12 = vld [vmem:[#allocation12 + $0x48] ss:$12 sps:$4 sm:$0xff]   ;;  %v953_v15 = vld [vmem:[#allocation12 + $0x60] ss:$12 sps:$4 sm:$0xff]  }
  0x83   :  { %v950_v13 = vld [vmem:[#allocation12 + $0x64] ss:$12 sps:$4 sm:$0xff]   ;;  %v952_v14 = vld [vmem:[#allocation12 + $0x68] ss:$12 sps:$4 sm:$0xff]   ;;  %v956_v17 = vld [vmem:[#allocation12 + $0x80] ss:$12 sps:$4 sm:$0xff]  }
  0x84   :  { %301 = vmatpush1.bf16.msra.mxu0 %v941_v6  ;;  %v954_v16 = vld [vmem:[#allocation12 + $0x7c] ss:$12 sps:$4 sm:$0xff]   ;;  %v1323_v18 = vld [vmem:[#allocation4] sm:$0xff]  ;;  %v962_v25 = vld [vmem:[#allocation12 + $0xac] ss:$12 sps:$4 sm:$0xff]   ;;  %s1138_s29 = scalar_lea.hbm %s1356_s7, 16 }
  0x85   :  { %856 = vmatpush3.bf16.msra.mxu1 %v940_v5  ;;  %302 = vmatprep.subr.bf16.mxu0 %v942_v7  ;;  %v957_v19 = vld [vmem:[#allocation12 + $0x78] ss:$12 sps:$4 sm:$0xff]   ;;  %v958_v21 = vld [vmem:[#allocation12 + $0x94] ss:$12 sps:$4 sm:$0xff]   ;;  %v136_v22 = vpack.c.bf16 %v1325_v20, %v1323_v18  ;;  %v961_v24 = vld [vmem:[#allocation12 + $0x90] ss:$12 sps:$4 sm:$0xff]   ;;  %p1139_p0 = scmp.ne.s32.totalorder %s1356_s7, %s1138_s29  ;;  %p1142_p1 = scmp.lt.u32.totalorder %s1138_s29, %s1356_s7 }
  0x86   :  { %857 = vmatprep.subr.bf16.mxu1 %v944_v8  ;;  %v960_v23 = vld [vmem:[#allocation12 + $0x98] ss:$12 sps:$4 sm:$0xff]   ;;  %v964_v26 = vld [vmem:[#allocation12 + $0xb0] ss:$12 sps:$4 sm:$0xff]   ;;  %v965_v27 = vld [vmem:[#allocation12 + $0xa8] ss:$12 sps:$4 sm:$0xff]  }
  0x87   :  { %869 = vmatprep.mubr.bf16.mxu1 %v136_v22  ;;  %v1329_v28 = vld [vmem:[#allocation4 + $0x10] sm:$0xff]  ;;  %v966_v29 = vld [vmem:[#allocation13] sm:$0xff]   ;;  %v967_v32 = vld [vmem:[#allocation13 + $0x8] sm:$0xff]   ;;  %p1144_p2 = pnand %p1142_p1, %p1139_p0 }
  0x88   :  { %303 = vmatpush1.bf16.msra.mxu0 %v945_v9  ;;  %v968_v30 = vld [vmem:[#allocation15] sm:$0xff]   ;;  %v137_v31 = vpack.c.bf16 %v1329_v28, %v1329_v28  ;;  %v970_v33 = vld [vmem:[#allocation15 + $0x8] sm:$0xff]   ;;  %v969_v34 = vld [vmem:[#allocation13 + $0x10] sm:$0xff]  }
  0x89   :  { %858 = vmatpush3.bf16.msra.mxu1 %v944_v8  ;;  %304 = vmatprep.subr.bf16.mxu0 %v946_v10  ;;  %v971_v35 = vld [vmem:[#allocation13 + $0x18] sm:$0xff]   ;;  %v972_v36 = vld [vmem:[#allocation15 + $0x10] sm:$0xff]   ;;  %v973_v37 = vld [vmem:[#allocation13 + $0x20] sm:$0xff]  }
  0x8a   :  { %859 = vmatprep.subr.bf16.mxu1 %v948_v11  ;;  %v974_v38 = vld [vmem:[#allocation15 + $0x18] sm:$0xff]   ;;  %v975_v39 = vld [vmem:[#allocation13 + $0x28] sm:$0xff]   ;;  %v976_v40 = vld [vmem:[#allocation15 + $0x20] sm:$0xff]  }
  0x8b   :  { %v977_v41 = vld [vmem:[#allocation13 + $0x30] sm:$0xff]   ;;  %v978_v42 = vld [vmem:[#allocation15 + $0x28] sm:$0xff]   ;;  %v979_v43 = vld [vmem:[#allocation13 + $0x38] sm:$0xff]  }
  0x8c   :  { %305 = vmatpush1.bf16.msra.mxu0 %v949_v12  ;;  %v980_v44 = vld [vmem:[#allocation15 + $0x30] sm:$0xff]   ;;  %v981_v45 = vld [vmem:[#allocation15 + $0x38] sm:$0xff]   ;;  %v669_v12 = vld [vmem:[#allocation7 + $0x8] sm:$0xff] }
  0x8d   :  { %860 = vmatpush3.bf16.msra.mxu1 %v948_v11  ;;  %306 = vmatprep.subr.bf16.mxu0 %v950_v13  ;;  %v668_v11 = vld [vmem:[#allocation7] sm:$0xff] }
  0x8e   :  { %861 = vmatprep.subr.bf16.mxu1 %v952_v14 }
  0x90   :  { %307 = vmatpush1.bf16.msra.mxu0 %v953_v15  ;;  %v675_v15 = vsub.f32 %v1325_v20, %v669_v12 }
  0x91   :  { %862 = vmatpush3.bf16.msra.mxu1 %v952_v14  ;;  %308 = vmatprep.subr.bf16.mxu0 %v954_v16  ;;  %v674_v14 = vsub.f32 %v1323_v18, %v668_v11 }
  0x92   :  { %863 = vmatprep.subr.bf16.mxu1 %v956_v17 }
  0x94   :  { %309 = vmatpush1.bf16.msra.mxu0 %v957_v19 }
  0x95   :  { %864 = vmatpush3.bf16.msra.mxu1 %v956_v17  ;;  %310 = vmatprep.subr.bf16.mxu0 %v958_v21  ;;  %v670_v17 = vld [vmem:[#allocation7 + $0x10] sm:$0xff] }
  0x96   :  { %865 = vmatprep.subr.bf16.mxu1 %v960_v23  ;;  %v676_v21 = vsub.f32 %v1329_v28, %v670_v17  ;;  %v672_v28 = vld [vmem:[#allocation9 + $0x8] sm:$0xff] }
  0x98   :  { %311 = vmatpush1.bf16.msra.mxu0 %v961_v24  ;;  %v647_v24 = vld [vmem:[#allocation10] sm:$0xff] }
  0x99   :  { %866 = vmatpush3.bf16.msra.mxu1 %v960_v23  ;;  %312 = vmatprep.subr.bf16.mxu0 %v962_v25  ;;  %v678_v23 = vmul.f32 %v675_v15, %v675_v15 }
  0x9a   :  { %867 = vmatprep.subr.bf16.mxu1 %v964_v26 }
  0x9c   :  { %313 = vmatpush1.bf16.msra.mxu0 %v965_v27 }
  0x9d   :  { %868 = vmatpush3.bf16.msra.mxu1 %v964_v26  ;;  %873 = vmatprep.subr.bf16.mxu0 %v966_v29  ;;  %v648_v26 = vld [vmem:[#allocation10 + $0x8] sm:$0xff] }
  0x9e   :  { %893 = vmatprep.subr.bf16.mxu1 %v968_v30 }
  0x9f   :  { %331 = vmatmul.mubr.bf16.vlgmr.msra.gmra.mrb[0].mxu0 %v136_v22 }
  0xa0   :  { %870 = vmatmul.mubr.bf16.vlgmr.msra.gmra.mrb[0].mxu1 %v137_v31  ;;  %340 = vmatprep.mubr.bf16.mxu0 %v1171_v0 }
  0xa1   :  { %874 = vmatpush3.bf16.msra.mxu0 %v966_v29  ;;  %894 = vmatpush3.bf16.msra.mxu1 %v968_v30  ;;  %v679_v30 = vmul.f32 %v676_v21, %v676_v21 }
  0xa2   :  { %875 = vmatprep.subr.bf16.mxu0 %v967_v32  ;;  %895 = vmatprep.subr.bf16.mxu1 %v970_v33 }
  0xa3   :  { %909 = vmatprep.mubr.bf16.mxu1 %v136_v22  ;;  %v677_v22 = vmul.f32 %v674_v14, %v674_v14 }
  0xa5   :  { %876 = vmatpush3.bf16.msra.mxu0 %v967_v32  ;;  %896 = vmatpush3.bf16.msra.mxu1 %v970_v33  ;;  %v649_v32 = vld [vmem:[#allocation10 + $0x10] sm:$0xff] }
  0xa6   :  { %877 = vmatprep.subr.bf16.mxu0 %v969_v34  ;;  %897 = vmatprep.subr.bf16.mxu1 %v972_v36 }
  0xa7   :  { %341 = vmatmul.mubr.bf16.gmra.mrb[4].mxu0 %v137_v31 }
  0xa9   :  { %878 = vmatpush3.bf16.msra.mxu0 %v969_v34  ;;  %898 = vmatpush3.bf16.msra.mxu1 %v972_v36 }
  0xaa   :  { %879 = vmatprep.subr.bf16.mxu0 %v971_v35  ;;  %899 = vmatprep.subr.bf16.mxu1 %v974_v38 }
  0xad   :  { %880 = vmatpush3.bf16.msra.mxu0 %v971_v35  ;;  %900 = vmatpush3.bf16.msra.mxu1 %v974_v38  ;;  %v671_v38 = vld [vmem:[#allocation9] sm:$0xff] }
  0xae   :  { %881 = vmatprep.subr.bf16.mxu0 %v973_v37  ;;  %901 = vmatprep.subr.bf16.mxu1 %v976_v40 }
  0xb1   :  { %882 = vmatpush3.bf16.msra.mxu0 %v973_v37  ;;  %902 = vmatpush3.bf16.msra.mxu1 %v976_v40  ;;  %v719_v40 = vmul.f32 %v672_v28, %v672_v28 }
  0xb2   :  { %883 = vmatprep.subr.bf16.mxu0 %v975_v39  ;;  %903 = vmatprep.subr.bf16.mxu1 %v978_v42 }
  0xb5   :  { %884 = vmatpush3.bf16.msra.mxu0 %v975_v39  ;;  %904 = vmatpush3.bf16.msra.mxu1 %v978_v42  ;;  %v718_v39 = vmul.f32 %v671_v38, %v671_v38  ;;  %v673_v42 = vld [vmem:[#allocation9 + $0x10] sm:$0xff] }
  0xb6   :  { %885 = vmatprep.subr.bf16.mxu0 %v977_v41  ;;  %905 = vmatprep.subr.bf16.mxu1 %v980_v44 }
  0xb9   :  { %886 = vmatpush3.bf16.msra.mxu0 %v977_v41  ;;  %906 = vmatpush3.bf16.msra.mxu1 %v980_v44 }
  0xba   :  { %887 = vmatprep.subr.bf16.mxu0 %v979_v43  ;;  %907 = vmatprep.subr.bf16.mxu1 %v981_v45 }
  0xbd   :  { %888 = vmatpush3.bf16.msra.mxu0 %v979_v43  ;;  %908 = vmatpush3.bf16.msra.mxu1 %v981_v45  ;;  %v721_v43 = vmul.f32 %v673_v42, %v673_v42  ;;  %v720_v45 = vadd.f32 %v719_v40, %v718_v39 }
  0xc0   :  { %910 = vmatmul.mubr.bf16.vlgmr.msra.gmra.mrb[4].mxu1 %v137_v31  ;;  %v680_v31 = vadd.f32 %v678_v23, %v677_v22 }
  0xc2   :  { %v681_v35 = vadd.f32 %v680_v31, %v679_v30 }
  0xc4   :  { %682 = vadd.xlane.f32.xlu0 %v681_v35 }
 0x172   :  { %v332_v46 = vpop.f32.mrb[0].mxu0 }
 0x173   :  { %v871_v47 = vpop.f32.mrb[0].mxu1  ;;  %v334_v48 = vpop.f32.mrb[1].mxu0 }
 0x174   :  { %v383_v49 = vpop.f32.mrb[1].mxu1  ;;  %v397_v50 = vsub.f32 %v334_v48, %v332_v46  ;;  %v336_v52 = vpop.f32.mrb[2].mxu0 }
 0x175   :  { %v400_v51 = vsub.f32 %v383_v49, %v332_v46  ;;  %v872_v53 = vpop.f32.mrb[2].mxu1  ;;  %v338_v54 = vpop.f32.mrb[3].mxu0 }
 0x176   :  { %v386_v55 = vpop.f32.mrb[3].mxu1  ;;  %v398_v56 = vsub.f32 %v338_v54, %v336_v52 }
 0x177   :  { %v401_v57 = vsub.f32 %v386_v55, %v336_v52  ;;  %v722_v52 = vadd.f32 %v721_v43, %v720_v45 }
 0x178   :  { %v410_v58 = vmul.f32 %v400_v51, %v398_v56 }
 0x179   :  { %v409_v59 = vmul.f32 %v401_v57, %v397_v50 }
 0x17a   :  { %v342_v61 = vpop.f32.mrb[4].mxu0 }
 0x17b   :  { %v411_v60 = vsub.f32 %v409_v59, %v410_v58  ;;  %v402_v62 = vsub.f32 %v871_v47, %v342_v61  ;;  %v344_v63 = vpop.f32.mrb[5].mxu0 }
 0x17c   :  { %v399_v0 = vsub.f32 %v344_v63, %v342_v61  ;;  %v346_v1 = vpop.f32.mrb[6].mxu0  ;;  %v727_v61 = vlaneseq }
 0x17d   :  { %v403_v2 = vmul.f32 %v402_v62, %v398_v56  ;;  %v407_v3 = vmul.f32 %v402_v62, %v397_v50  ;;  %v347_v4 = vpop.f32.mrb[7].mxu0  ;;  %v416_v10 = vpack.c.bf16 %v411_v60, %v411_v60 }
 0x17e   :  { %v404_v5 = vmul.f32 %v401_v57, %v399_v0  ;;  %v406_v6 = vmul.f32 %v400_v51, %v399_v0  ;;  %v728_v62 = vshrl.u32 %v727_v61, 7  ;;  %v731_v63 = vand.u32 127, %v727_v61 }
 0x180   :  { %v405_v7 = vsub.f32 %v403_v2, %v404_v5  ;;  %v408_v8 = vsub.f32 %v406_v6, %v407_v3  ;;  %vm729_vm0 = vcmp.lt.s32.totalorder %v728_v62, 2  ;;  %vm732_vm1 = vcmp.lt.s32.totalorder %v731_v63, 42  ;;  %v683_v3 = vpop.xlane.xlu0 %682 }
 0x181   :  { %vm733_vm2 = vmand %vm729_vm0, %vm732_vm1  ;;  %v684_v5 = vrot.slane %v683_v3, 4 }
 0x182   :  { %v415_v9 = vpack.c.bf16 %v408_v8, %v405_v7 }
 0x183   :  { %v685_v6 = vadd.f32 %v684_v5, %v683_v3 }
 0x184   :  { %889 = vmatprep.mubr.bf16.mxu0 %v415_v9 }
 0x185   :  { %890 = vmatmul.mubr.bf16.vlgmr.msra.gmra.mrb[8].mxu0 %v416_v10  ;;  %v686_v9 = vrot.slane %v685_v6, 2 }
 0x193   :  { %v911_v13 = vpop.f32.mrb[4].mxu1 }
 0x194   :  { %v633_v16 = vpop.f32.mrb[5].mxu1  ;;  %v652_v33 = vsub.f32 %v911_v13, %v649_v32  ;;  %v687_v13 = vadd.f32 %v686_v9, %v685_v6 }
 0x195   :  { %v912_v19 = vpop.f32.mrb[6].mxu1  ;;  %v650_v27 = vsub.f32 %v633_v16, %v647_v24 }
 0x196   :  { %v636_v25 = vpop.f32.mrb[7].mxu1  ;;  %v658_v20 = vmul.f32 %v652_v33, %v652_v33  ;;  %v688_v14 = vrot.slane %v687_v13, 1 }
 0x197   :  { %v651_v29 = vsub.f32 %v636_v25, %v648_v26  ;;  %v656_v34 = vmul.f32 %v650_v27, %v650_v27 }
 0x198   :  { %v689_v16 = vadd.f32 %v688_v14, %v687_v13 }
 0x199   :  { %v657_v18 = vmul.f32 %v651_v29, %v651_v29 }
 0x19a   :  { %913 = vpush %v689_v16 }
 0x19b   :  { %v694_v36 = vadd.f32 %v657_v18, %v656_v34 }
 0x19d   :  { %v695_v37 = vadd.f32 %v694_v36, %v658_v20 }
 0x19f   :  { %696 = vadd.xlane.f32.xlu0 %v695_v37 }
 0x1cb   :  { %s914_s6 = spop %913 }
 0x1cc   :  { %s747_s3 = smul.f32 0.003968254, %s914_s6 }
 0x1ce   :  { %759 = sst [smem:[#allocation16]] %s747_s3 }
 0x22c   :  { %v697_v7 = vpop.xlane.xlu0 %696 }
 0x22d   :  { %v698_v8 = vrot.slane %v697_v7, 4 }
 0x22f   :  { %v699_v10 = vadd.f32 %v698_v8, %v697_v7 }
 0x231   :  { %v700_v11 = vrot.slane %v699_v10, 2 }
 0x233   :  { %v701_v12 = vadd.f32 %v700_v11, %v699_v10 }
 0x235   :  { %v702_v15 = vrot.slane %v701_v12, 1 }
 0x237   :  { %v703_v17 = vadd.f32 %v702_v15, %v701_v12 }
 0x239   :  { %915 = vpush %v703_v17 }
 0x258   :  { %v891_v41 = vpop.f32.mrb[8].mxu0 }
 0x259   :  { %v515_v44 = vpop.f32.mrb[9].mxu0  ;;  %v710_v53 = vmul.f32 %v891_v41, %v673_v42  ;;  %v716_v54 = vmul.f32 %v891_v41, %v891_v41 }
 0x25a   :  { %v892_v46 = vpop.f32.mrb[10].mxu0  ;;  %v708_v48 = vmul.f32 %v671_v38, %v515_v44  ;;  %v713_v49 = vmul.f32 %v515_v44, %v515_v44 }
 0x25b   :  { %v518_v47 = vpop.f32.mrb[11].mxu0 }
 0x25c   :  { %v709_v50 = vmul.f32 %v672_v28, %v518_v47  ;;  %v714_v51 = vmul.f32 %v518_v47, %v518_v47 }
 0x25e   :  { %v711_v55 = vadd.f32 %v709_v50, %v708_v48  ;;  %v715_v56 = vadd.f32 %v714_v51, %v713_v49 }
 0x260   :  { %v717_v57 = vadd.f32 %v716_v54, %v715_v56  ;;  %v712_v58 = vadd.f32 %v711_v55, %v710_v53 }
 0x262   :  { %v723_v59 = vmul.f32 %v722_v52, %v717_v57 }
 0x264   :  { %v724_v60 = vmax.f32 %v723_v59, 1e-16 }
 0x266   :  { %982 = vrsqrt.f32 %v724_v60 }
 0x26a   :  { %s916_s27 = spop %915 }
 0x26b   :  { %s753_s18 = smul.f32 0.003968254, %s916_s27 }
 0x26d   :  { %763 = sst [smem:[#allocation16 + $0x2]] %s753_s18  ;;  %s756_s23 = smul.f32 0.5, %s753_s18 }
 0x270   :  { %v983_v0 = vpop.eup %982 }
 0x271   :  { %v726_v1 = vmul.f32 %v983_v0, %v712_v58 }
 0x273   :  { %v734_v2 = vsub.f32 1.0, %v726_v1 }
 0x275   :  { %v735_v4 = vsel %vm733_vm2, %v734_v2, 0.0 }
 0x276   :  { %736 = vadd.xlane.f32.xlu1 %v735_v4 }
 0x303   :  { %v737_v19 = vpop.xlane.xlu1 %736 }
 0x304   :  { %v738_v21 = vrot.slane %v737_v19, 4 }
 0x306   :  { %v739_v22 = vadd.f32 %v738_v21, %v737_v19 }
 0x308   :  { %v740_v23 = vrot.slane %v739_v22, 2 }
 0x30a   :  { %v741_v24 = vadd.f32 %v740_v23, %v739_v22 }
 0x30c   :  { %v742_v25 = vrot.slane %v741_v24, 1 }
 0x30e   :  { %v743_v26 = vadd.f32 %v742_v25, %v741_v24 }
 0x310   :  { %917 = vpush %v743_v26 }
 0x341   :  { %s918_s19 = spop %917 }
 0x342   :  { %s750_s20 = smul.f32 0.011904762, %s918_s19 }
 0x344   :  { %s754_s22 = smul.f32 0.1, %s750_s20  ;;  %761 = sst [smem:[#allocation16 + $0x1]] %s750_s20 }
 0x346   :  { %s755_s24 = sadd.f32 %s754_s22, %s747_s3 }
 0x348   :  { %s757_s1 = sadd.f32 %s756_s23, %s755_s24 }
 0x34a   :  { %765 = sst [smem:[#allocation16 + $0x3]] %s757_s1 }
 0x34b   :  { %1147 = shalt.err (!%p1144_p2)
}
 0x34c   :  { %s1172_s21 = smov [#allocation16]  }
 0x34d   :  { %773 = dma.smem_to_hbm %s1172_s21, 16, %s1356_s7, [#allocation6]  }
 0x34e   :  { %1156 = dma.done.wait [#allocation6], 16  }
 0x34f   :  { %1157 = vsyncadd [#allocation6], 4294967280 }
 0x350   :  { %777 = sfence }
 0x351   :  { %778 = vsyncpa [#allocation5], 1 }
 0x352   :  { %779 = vsyncpa [#allocation8], 1 }
 0x353   :  { %780 = vsyncpa [#allocation11], 1 }
 0x354   :  { %781 = vsyncpa [#allocation14], 1 }
 0x355   :  { %782 = vsyncpa [#allocation6], 1 }

</bundles_post_ra>
